<compile_context>
chip_gen: v7x
topology: tpu7x:2x2x1
jax: 0.10.0
libtpu: 0.0.40
codegen_flags: <defaults>
</compile_context>

<pallas_src>
import math
import functools

import jax
import jax.numpy as jnp
from jax.experimental import pallas as pl
from jax.experimental.pallas import tpu as pltpu

BN_EPS = 1e-5
LANE = 128


def _round_up(x, m):
    return (x + m - 1) // m * m


def _pow2_divisor(n, cap):
    """Largest power-of-two t with 8 <= t <= cap and n % t == 0 (n multiple of 8)."""
    t = 8
    while t * 2 <= cap and n % (t * 2) == 0:
        t *= 2
    return t


def _fused_tile(mo, c):
    """Row tile for the fused kernel: power of two, <=512, >=2 grid steps when
    possible, and the (4, tm, C) f32 input block kept under ~4 MiB."""
    t = 512
    while t > 8 and (t > mo // 2 or 4 * t * c * 4 > (4 << 20)):
        t //= 2
    return max(t, 8)


def _vmem_limit(block_bytes):
    # Inputs/outputs are double-buffered; add slack for compiler-internal scratch.
    need = 2 * block_bytes + (2 << 20)
    return int(min(max(need, 16 << 20), 32 << 20))


# --------------------------------------------------------------------------
# Kernel 1: tiled, megacore-friendly BatchNorm partial sums
#   output: (n_split, 2, C)  with row 0 = sum(x), row 1 = sum(x*x) per split
# --------------------------------------------------------------------------
def _bn_partial_kernel(x_ref, out_ref, acc_ref):
    i = pl.program_id(1)

    @pl.when(i == 0)
    def _init():
        acc_ref[...] = jnp.zeros_like(acc_ref)

    x = x_ref[...]                                           # (tm, C) f32
    # One (2, C) scratch write per tile (avoids two masked sublane-slice RMWs).
    acc_ref[...] += jnp.concatenate(
        [jnp.sum(x, axis=0, keepdims=True),
         jnp.sum(x * x, axis=0, keepdims=True)], axis=0)

    @pl.when(i == pl.num_programs(1) - 1)
    def _finalize():
        out_ref[...] = acc_ref[...]


def bn_partial_sums(x2d):
    M, C = x2d.shape
    n_split = 2 if M % 16 == 0 else 1        # leading "parallel" axis (v7x megacore)
    per_slice = M // n_split
    cap = min(1024,
              per_slice // 2 if per_slice >= 16 else per_slice,
              max(8, (4 << 20) // (C * 4)))   # keep each block under ~4 MiB
    tm = _pow2_divisor(per_slice, cap)
    steps = per_slice // tm

    blk_bytes = tm * C * 4 + 2 * C * 4

    return pl.pallas_call(
        _bn_partial_kernel,
        out_shape=jax.ShapeDtypeStruct((n_split, 2, C), jnp.float32),
        grid_spec=pltpu.PrefetchScalarGridSpec(
            num_scalar_prefetch=0,
            grid=(n_split, steps),
            in_specs=[pl.BlockSpec((tm, C), lambda p, i: (p * steps + i, 0))],
            out_specs=pl.BlockSpec((pl.Squeezed(), 2, C), lambda p, i: (p, 0, 0)),
            scratch_shapes=[pltpu.VMEM((2, C), jnp.float32)],
        ),
        compiler_params=pltpu.CompilerParams(
            dimension_semantics=("parallel", "arbitrary"),
            vmem_limit_bytes=_vmem_limit(blk_bytes)),
    )(x2d)


# --------------------------------------------------------------------------
# Kernel 2: fused BN-apply + ReLU + 2x2 avg pool + 1x1 conv (bf16 MXU)
# --------------------------------------------------------------------------
def _fused_bn_relu_pool_conv_kernel(x_ref, ss_ref, w_ref, o_ref):
    # x_ref : (4, tm, C) f32  - the 4 pixel planes of each 2x2 pooling window
    # ss_ref: (2, C)     f32  - BN scale / shift
    # w_ref : (C, Np)    bf16 - 1x1 conv weight, pre-scaled by 0.25, lane padded
    # o_ref : (tm, Np)   f32
    scale = ss_ref[0:1, :]                                   # (1, C), broadcasts
    shift = ss_ref[1:2, :]

    def bn_relu(p):
        return jnp.maximum(x_ref[p] * scale + shift, 0.0)    # (tm, C) VPU

    # 2x2 avg pool = three full-tile adds; the 1/4 factor lives in the weight.
    pooled = (bn_relu(0) + bn_relu(1)) + (bn_relu(2) + bn_relu(3))
    # TODO(synk): on v6e/v7x the elementwise path above could run in bf16;
    # kept in f32 so the same kernel is also correct on v5e (no bf16 VPU).
    o_ref[...] = jnp.dot(pooled.astype(jnp.bfloat16), w_ref[...],
                         preferred_element_type=jnp.float32)


def fused_bn_relu_pool_conv(x_win, scale_shift, w_pad, tm):
    P, Mo, C = x_win.shape
    _, Np = w_pad.shape
    steps = Mo // tm
    blk_bytes = 4 * tm * C * 4 + 2 * C * 4 + C * Np * 2 + tm * Np * 4
    return pl.pallas_call(
        _fused_bn_relu_pool_conv_kernel,
        out_shape=jax.ShapeDtypeStruct((Mo, Np), jnp.float32),
        grid_spec=pltpu.PrefetchScalarGridSpec(
            num_scalar_prefetch=0,
            grid=(steps,),
            in_specs=[pl.BlockSpec((4, tm, C), lambda i: (0, i, 0)),
                      pl.BlockSpec((2, C), lambda i: (0, 0)),
                      pl.BlockSpec((C, Np), lambda i: (0, 0))],
            out_specs=pl.BlockSpec((tm, Np), lambda i: (i, 0)),
        ),
        compiler_params=pltpu.CompilerParams(
            dimension_semantics=("parallel",),
            vmem_limit_bytes=_vmem_limit(blk_bytes)),
    )(x_win, scale_shift, w_pad)


# --------------------------------------------------------------------------
# Transition module forward (NCHW in, NCHW out, like the PyTorch module)
# --------------------------------------------------------------------------
def transition_forward(params, x_nchw, out_planes):
    N, C, H, W = x_nchw.shape
    assert H % 2 == 0 and W % 2 == 0
    Ho, Wo = H // 2, W // 2
    Mo = N * Ho * Wo
    M_true = N * H * W

    xf = x_nchw.astype(jnp.float32)
    # Single wrapper-side layout pass: NCHW -> (window-pixel, N*Ho*Wo, C).
    # TODO(synk): if the surrounding model supplies NHWC activations this
    # transpose (an extra HBM round trip of x) can be dropped entirely.
    xw = (xf.reshape(N, C, Ho, 2, Wo, 2)
            .transpose(3, 5, 0, 2, 4, 1)
            .reshape(4, Mo, C))

    tm = _fused_tile(Mo, C)
    Mo_pad = _round_up(Mo, tm)
    if Mo_pad != Mo:
        xw = jnp.pad(xw, ((0, 0), (0, Mo_pad - Mo), (0, 0)))

    # Pass 1: tiled BN partial sums (zero padding rows contribute 0 to both
    # sums, and we divide by the true pixel count, so stats stay exact).
    partials = bn_partial_sums(xw.reshape(4 * Mo_pad, C))     # (n_split, 2, C)
    sums = jnp.sum(partials, axis=0)                          # tiny epilogue
    inv_m = 1.0 / float(M_true)
    mean = sums[0] * inv_m
    var = jnp.maximum(sums[1] * inv_m - mean * mean, 0.0)     # biased, clamped
    scale = params['bn_g'] * jax.lax.rsqrt(var + BN_EPS)
    shift = params['bn_b'] - mean * scale
    ss = jnp.stack([scale, shift])                            # (2, C)

    # Pass 2: fused BN-apply + ReLU + 2x2 avg pool + 1x1 conv.
    out = fused_bn_relu_pool_conv(xw, ss, params['conv_w_pad'], tm)  # (Mo_pad, Np)

    out = out[:Mo, :out_planes].reshape(N, Ho, Wo, out_planes)
    return jnp.transpose(out, (0, 3, 1, 2))                   # back to NCHW


# --------------------------------------------------------------------------
# Deterministic parameter construction (weight pre-transposed, lane-padded,
# pre-scaled by the 2x2 avg-pool factor 1/4).
# --------------------------------------------------------------------------
def init_transition_params(key, in_planes, out_planes):
    k1, k2, k3 = jax.random.split(key, 3)
    w = (jax.random.normal(k1, (out_planes, in_planes), jnp.float32)
         * (1.0 / math.sqrt(in_planes)))                 # torch-like (Cout, Cin)
    n_pad = _round_up(out_planes, LANE)
    w_pad = (jnp.zeros((in_planes, n_pad), jnp.float32)
             .at[:, :out_planes].set(0.25 * w.T))        # fold pool factor (exact)
    gamma = 1.0 + 0.1 * jax.random.normal(k2, (in_planes,), jnp.float32)
    beta = 0.1 * jax.random.normal(k3, (in_planes,), jnp.float32)
    return dict(bn_g=gamma, bn_b=beta, conv_w_pad=w_pad.astype(jnp.bfloat16))


# --------------------------------------------------------------------------
# Pure-JAX reference (same bf16 weight, conv then pool) for a sanity check.
# --------------------------------------------------------------------------
def _reference(params, x_nchw, out_planes):
    xf = x_nchw.astype(jnp.float32)
    mean = jnp.mean(xf, axis=(0, 2, 3), keepdims=True)
    var = jnp.mean((xf - mean) ** 2, axis=(0, 2, 3), keepdims=True)
    g = params['bn_g'].reshape(1, -1, 1, 1)
    b = params['bn_b'].reshape(1, -1, 1, 1)
    y = jnp.maximum((xf - mean) * jax.lax.rsqrt(var + BN_EPS) * g + b, 0.0)
    # undo the pre-folded 1/4 pool factor to recover the raw conv weight
    w = params['conv_w_pad'].astype(jnp.float32)[:, :out_planes] * 4.0
    z = jnp.einsum('nchw,cd->ndhw', y, w)
    N, D, H, W = z.shape
    return z.reshape(N, D, H // 2, 2, W // 2, 2).mean(axis=(3, 5))


# --------------------------------------------------------------------------
if __name__ == "__main__":
    key = jax.random.PRNGKey(0)
    pkey, xkey = jax.random.split(key)

    N, C_IN, H, W = 2, 48, 32, 32
    C_OUT = 24

    params = init_transition_params(pkey, C_IN, C_OUT)
    x = jax.random.normal(xkey, (N, C_IN, H, W), jnp.float32)

    fwd = jax.jit(functools.partial(transition_forward, out_planes=C_OUT))
    out = fwd(params, x)
    jax.block_until_ready(out)

    assert out.shape == (N, C_OUT, H // 2, W // 2), out.shape
    assert bool(jnp.all(jnp.isfinite(out)))

    ref = _reference(params, x, C_OUT)
    assert bool(jnp.allclose(out, ref, atol=5e-2, rtol=5e-2)), \
        float(jnp.max(jnp.abs(out - ref)))

    print("KERNEL_OK")
</pallas_src>

<mosaic_0001>
module attributes {stable_mosaic.version = 11 : i64} {
  func.func @_bn_partial_kernel(%arg0: i32, %arg1: i32, %arg2: memref<512x48xf32, #tpu.memory_space<vmem>>, %arg3: memref<1x2x48xf32, #tpu.memory_space<vmem>>, %arg4: memref<2x48xf32, #tpu.memory_space<vmem>>) attributes {dimension_semantics = [#tpu.dimension_semantics<parallel>, #tpu.dimension_semantics<arbitrary>], iteration_bounds = array<i64: 2, 2>, scalar_prefetch = 0 : i64, scratch_operands = 1 : i64, tpu.core_type = #tpu.core_type<tc>, window_params = [{transform_indices = @transform_0, window_bounds = array<i64: 512, 48>}, {transform_indices = @transform_1, window_bounds = array<i64: 1, 2, 48>}]} {
    %c0_i32 = arith.constant 0 : i32
    %0 = arith.cmpi eq, %arg1, %c0_i32 : i32
    %1 = arith.extui %0 : i1 to i32
    %c0_i32_0 = arith.constant 0 : i32
    %2 = arith.cmpi ne, %1, %c0_i32_0 : i32
    scf.if %2 {
      %cst_8 = arith.constant 0.000000e+00 : f32
      %16 = vector.broadcast %cst_8 : f32 to vector<2x48xf32>
      %c0_9 = arith.constant 0 : index
      %c0_10 = arith.constant 0 : index
      %17 = vector.load %arg4[%c0_9, %c0_10] : memref<2x48xf32, #tpu.memory_space<vmem>>, vector<2x48xf32>
      tpu.vector_store %arg4[%c0_9, %c0_10], %16 {strides = array<i32>} : memref<2x48xf32, #tpu.memory_space<vmem>>, vector<2x48xf32>,
    } else {
    }
    %c0 = arith.constant 0 : index
    %c0_1 = arith.constant 0 : index
    %3 = vector.load %arg2[%c0, %c0_1] : memref<512x48xf32, #tpu.memory_space<vmem>>, vector<512x48xf32>
    %c0_2 = arith.constant 0 : index
    %c0_3 = arith.constant 0 : index
    %4 = vector.load %arg4[%c0_2, %c0_3] : memref<2x48xf32, #tpu.memory_space<vmem>>, vector<2x48xf32>
    %cst = arith.constant dense<0.000000e+00> : vector<48xf32>
    %5 = vector.multi_reduction <add>, %3, %cst [0] : vector<512x48xf32> to vector<48xf32>
    %6 = vector.shape_cast %5 : vector<48xf32> to vector<1x48xf32>
    %7 = arith.mulf %3, %3 : vector<512x48xf32>
    %cst_4 = arith.constant dense<0.000000e+00> : vector<48xf32>
    %8 = vector.multi_reduction <add>, %7, %cst_4 [0] : vector<512x48xf32> to vector<48xf32>
    %9 = vector.shape_cast %8 : vector<48xf32> to vector<1x48xf32>
    %10 = tpu.concatenate %6, %9 in 0 : vector<1x48xf32>, vector<1x48xf32> -> vector<2x48xf32>
    %11 = arith.addf %4, %10 : vector<2x48xf32>
    %c0_5 = arith.constant 0 : index
    %c0_6 = arith.constant 0 : index
    %12 = vector.load %arg4[%c0_5, %c0_6] : memref<2x48xf32, #tpu.memory_space<vmem>>, vector<2x48xf32>
    tpu.vector_store %arg4[%c0_5, %c0_6], %11 {strides = array<i32>} : memref<2x48xf32, #tpu.memory_space<vmem>>, vector<2x48xf32>,
    %c1_i32 = arith.constant 1 : i32
    %13 = arith.cmpi eq, %arg1, %c1_i32 : i32
    %14 = arith.extui %13 : i1 to i32
    %c0_i32_7 = arith.constant 0 : i32
    %15 = arith.cmpi ne, %14, %c0_i32_7 : i32
    scf.if %15 {
      %c0_8 = arith.constant 0 : index
      %c0_9 = arith.constant 0 : index
      %16 = vector.load %arg4[%c0_8, %c0_9] : memref<2x48xf32, #tpu.memory_space<vmem>>, vector<2x48xf32>
      %c0_10 = arith.constant 0 : index
      %c0_11 = arith.constant 0 : index
      %c0_12 = arith.constant 0 : index
      %17 = vector.load %arg3[%c0_10, %c0_11, %c0_12] : memref<1x2x48xf32, #tpu.memory_space<vmem>>, vector<1x2x48xf32>
      %18 = vector.shape_cast %17 : vector<1x2x48xf32> to vector<2x48xf32>
      %19 = vector.shape_cast %16 : vector<2x48xf32> to vector<1x2x48xf32>
      tpu.vector_store %arg3[%c0_10, %c0_11, %c0_12], %19 {strides = array<i32>} : memref<1x2x48xf32, #tpu.memory_space<vmem>>, vector<1x2x48xf32>,
    } else {
    }
    return
  }
  func.func @transform_0(%arg0: i32, %arg1: i32) -> (i32, i32) {
    %c2_i32 = arith.constant 2 : i32
    %0 = arith.muli %arg0, %c2_i32 : i32
    %1 = arith.addi %0, %arg1 : i32
    %c0_i32 = arith.constant 0 : i32
    %c0_i32_0 = arith.constant 0 : i32
    return %1, %c0_i32 : i32, i32
  }
  func.func @transform_1(%arg0: i32, %arg1: i32) -> (i32, i32, i32) {
    %c0_i32 = arith.constant 0 : i32
    %c0_i32_0 = arith.constant 0 : i32
    %c0_i32_1 = arith.constant 0 : i32
    return %arg0, %c0_i32, %c0_i32_0 : i32, i32, i32
  }
}

module attributes {stable_mosaic.version = 11 : i64} {
  func.func @_fused_bn_relu_pool_conv_kernel(%arg0: i32, %arg1: memref<4x256x48xf32, #tpu.memory_space<vmem>>, %arg2: memref<2x48xf32, #tpu.memory_space<vmem>>, %arg3: memref<48x128xbf16, #tpu.memory_space<vmem>>, %arg4: memref<256x128xf32, #tpu.memory_space<vmem>>) attributes {dimension_semantics = [#tpu.dimension_semantics<parallel>], iteration_bounds = array<i64: 2>, scalar_prefetch = 0 : i64, scratch_operands = 0 : i64, tpu.core_type = #tpu.core_type<tc>, window_params = [{transform_indices = @transform_0, window_bounds = array<i64: 4, 256, 48>}, {pipeline_mode = #tpu.pipeline_mode<synchronous>, transform_indices = @transform_1, window_bounds = array<i64: 2, 48>}, {pipeline_mode = #tpu.pipeline_mode<synchronous>, transform_indices = @transform_2, window_bounds = array<i64: 48, 128>}, {transform_indices = @transform_3, window_bounds = array<i64: 256, 128>}]} {
    %c0 = arith.constant 0 : index
    %c0_0 = arith.constant 0 : index
    %0 = vector.load %arg2[%c0, %c0_0] : memref<2x48xf32, #tpu.memory_space<vmem>>, vector<1x48xf32>
    %c1 = arith.constant 1 : index
    %c0_1 = arith.constant 0 : index
    %1 = vector.load %arg2[%c1, %c0_1] : memref<2x48xf32, #tpu.memory_space<vmem>>, vector<1x48xf32>
    %c0_2 = arith.constant 0 : index
    %c0_3 = arith.constant 0 : index
    %c0_4 = arith.constant 0 : index
    %2 = vector.load %arg1[%c0_2, %c0_3, %c0_4] : memref<4x256x48xf32, #tpu.memory_space<vmem>>, vector<1x256x48xf32>
    %3 = vector.shape_cast %2 : vector<1x256x48xf32> to vector<256x48xf32>
    %4 = vector.broadcast %0 : vector<1x48xf32> to vector<256x48xf32>
    %5 = arith.mulf %3, %4 : vector<256x48xf32>
    %6 = vector.broadcast %1 : vector<1x48xf32> to vector<256x48xf32>
    %7 = arith.addf %5, %6 : vector<256x48xf32>
    %cst = arith.constant 0.000000e+00 : f32
    %8 = vector.broadcast %cst : f32 to vector<256x48xf32>
    %9 = arith.maximumf %7, %8 : vector<256x48xf32>
    %c1_5 = arith.constant 1 : index
    %c0_6 = arith.constant 0 : index
    %c0_7 = arith.constant 0 : index
    %10 = vector.load %arg1[%c1_5, %c0_6, %c0_7] : memref<4x256x48xf32, #tpu.memory_space<vmem>>, vector<1x256x48xf32>
    %11 = vector.shape_cast %10 : vector<1x256x48xf32> to vector<256x48xf32>
    %12 = vector.broadcast %0 : vector<1x48xf32> to vector<256x48xf32>
    %13 = arith.mulf %11, %12 : vector<256x48xf32>
    %14 = vector.broadcast %1 : vector<1x48xf32> to vector<256x48xf32>
    %15 = arith.addf %13, %14 : vector<256x48xf32>
    %cst_8 = arith.constant 0.000000e+00 : f32
    %16 = vector.broadcast %cst_8 : f32 to vector<256x48xf32>
    %17 = arith.maximumf %15, %16 : vector<256x48xf32>
    %18 = arith.addf %9, %17 : vector<256x48xf32>
    %c2 = arith.constant 2 : index
    %c0_9 = arith.constant 0 : index
    %c0_10 = arith.constant 0 : index
    %19 = vector.load %arg1[%c2, %c0_9, %c0_10] : memref<4x256x48xf32, #tpu.memory_space<vmem>>, vector<1x256x48xf32>
    %20 = vector.shape_cast %19 : vector<1x256x48xf32> to vector<256x48xf32>
    %21 = vector.broadcast %0 : vector<1x48xf32> to vector<256x48xf32>
    %22 = arith.mulf %20, %21 : vector<256x48xf32>
    %23 = vector.broadcast %1 : vector<1x48xf32> to vector<256x48xf32>
    %24 = arith.addf %22, %23 : vector<256x48xf32>
    %cst_11 = arith.constant 0.000000e+00 : f32
    %25 = vector.broadcast %cst_11 : f32 to vector<256x48xf32>
    %26 = arith.maximumf %24, %25 : vector<256x48xf32>
    %c3 = arith.constant 3 : index
    %c0_12 = arith.constant 0 : index
    %c0_13 = arith.constant 0 : index
    %27 = vector.load %arg1[%c3, %c0_12, %c0_13] : memref<4x256x48xf32, #tpu.memory_space<vmem>>, vector<1x256x48xf32>
    %28 = vector.shape_cast %27 : vector<1x256x48xf32> to vector<256x48xf32>
    %29 = vector.broadcast %0 : vector<1x48xf32> to vector<256x48xf32>
    %30 = arith.mulf %28, %29 : vector<256x48xf32>
    %31 = vector.broadcast %1 : vector<1x48xf32> to vector<256x48xf32>
    %32 = arith.addf %30, %31 : vector<256x48xf32>
    %cst_14 = arith.constant 0.000000e+00 : f32
    %33 = vector.broadcast %cst_14 : f32 to vector<256x48xf32>
    %34 = arith.maximumf %32, %33 : vector<256x48xf32>
    %35 = arith.addf %26, %34 : vector<256x48xf32>
    %36 = arith.addf %18, %35 : vector<256x48xf32>
    %37 = arith.truncf %36 : vector<256x48xf32> to vector<256x48xbf16>
    %c0_15 = arith.constant 0 : index
    %c0_16 = arith.constant 0 : index
    %38 = vector.load %arg3[%c0_15, %c0_16] : memref<48x128xbf16, #tpu.memory_space<vmem>>, vector<48x128xbf16>
    %cst_17 = arith.constant dense<0.000000e+00> : vector<256x128xf32>
    %39 = tpu.matmul %37, %38, %cst_17 {dimension_numbers = #tpu.dot_dimension_numbers<[1], [0], [0], [1], [0, 0, 1, 1], [], []>} : vector<256x48xbf16>, vector<48x128xbf16>, vector<256x128xf32> -> vector<256x128xf32>
    %c0_18 = arith.constant 0 : index
    %c0_19 = arith.constant 0 : index
    %40 = vector.load %arg4[%c0_18, %c0_19] : memref<256x128xf32, #tpu.memory_space<vmem>>, vector<256x128xf32>
    tpu.vector_store %arg4[%c0_18, %c0_19], %39 {strides = array<i32>} : memref<256x128xf32, #tpu.memory_space<vmem>>, vector<256x128xf32>,
    return
  }
  func.func @transform_0(%arg0: i32) -> (i32, i32, i32) {
    %c0_i32 = arith.constant 0 : i32
    %c0_i32_0 = arith.constant 0 : i32
    %c0_i32_1 = arith.constant 0 : i32
    return %c0_i32, %arg0, %c0_i32_0 : i32, i32, i32
  }
  func.func @transform_1(%arg0: i32) -> (i32, i32) {
    %c0_i32 = arith.constant 0 : i32
    %c0_i32_0 = arith.constant 0 : i32
    %c0_i32_1 = arith.constant 0 : i32
    return %c0_i32, %c0_i32_0 : i32, i32
  }
  func.func @transform_2(%arg0: i32) -> (i32, i32) {
    %c0_i32 = arith.constant 0 : i32
    %c0_i32_0 = arith.constant 0 : i32
    %c0_i32_1 = arith.constant 0 : i32
    return %c0_i32, %c0_i32_0 : i32, i32
  }
  func.func @transform_3(%arg0: i32) -> (i32, i32) {
    %c0_i32 = arith.constant 0 : i32
    %c0_i32_0 = arith.constant 0 : i32
    return %arg0, %c0_i32 : i32, i32
  }
}

</mosaic_0001>

<bundles_post_ra>
// kernel: transition_forward.2
= control target key start
LH: loop header
LB: loop body
LE: loop exit
PB: predicated region body
PF: predicated region fallthrough
CT: control target
= control target key end

     0   :  { %s727_s6 = smov 0   ;;  %s729_s7 = smov 0   ;;  %s1225_s0 = inlined_call_operand.vmem [shape: f32[2048,48], index: 0, kind: input, shape index: {}]   ;;  %s1226_s1 = inlined_call_operand.vmem [shape: f32[2,2,48], index: 1, kind: output, shape index: {}]  }
   0x1   :  { %s731_s8 = smov 0   ;;  %s733_s9 = smov 0  }
   0x2   :  { %s735_s10 = smov 0  }
   0x3 LB: > { %s20_s11 = sadd.s32 1, %s706_s8  ;;  %s23_s12 = sadd.s32 1, %s710_s9  ;;  %s714_s10 = sphi %s735_s10, %s11_s10   ;;  %s710_s9 = sphi %s733_s9, %s1230_s9   ;;  %s706_s8 = sphi %s731_s8, %s1229_s8   ;;  %s702_s7 = sphi %s729_s7, %s1228_s7   ;;  %s698_s6 = sphi %s727_s6, %s1227_s6  }
   0x4   : > { %p21_p0 = scmp.ge.s32.totalorder %s20_s11, 2  ;;  %p626_p1 = scmp.ge.s32.totalorder %s714_s10, 1 }
   0x5   : > { %p108_p2 = scmp.lt.s32.totalorder %s714_s10, 5 }
   0x6   : > { %s1232_s11 = smov (%p21_p0, %s20_s11), 0  ;;  %s1234_s12 = smov (!%p21_p0, %s23_s12), %s710_s9 }
   0x7   : > { %p109_p3 = pnand %p626_p1, %p108_p2  ;;  %p25_p4 = scmp.ge.s32.totalorder %s1234_s12, 2 }
   0x8   : > { %s627_s13 = sshll.u32 (!%p109_p3), %s702_s7, 1  ;;  %p139_p5 = scmp.lt.s32.totalorder (!%p109_p3), %s702_s7, 1 }
   0x9   : > { %s1236_s12 = smov (%p25_p4, %s1234_s12), 0  ;;  %112 = sbr.rel (%p109_p3) target bundleno = 198 (0xc6), region = 24 }
   0xa   : > { %s130_s14 = sadd.s32 (!%p109_p3), %s698_s6, %s627_s13  ;;  %p631_p7 = scmp.ne.s32.totalorder (!%p109_p3), %s698_s6, 0 }
   0xb   : > { %s628_s15 = sshll.u32 (!%p109_p3), %s130_s14, 6 }
   0xc   : > { %p132_p6 = scmp.lt.s32.totalorder (!%p109_p3), %s628_s15, 255 }
  0x10   : > { %s1238_s7 = smov (!%p139_p5, %s702_s7), 1  ;;  %s1240_s15 = smov (!%p132_p6, %s628_s15), 255 }
  0x11   : > { %s630_s16 = sshll.u32 %s1238_s7, 1  ;;  %s629_s17 = sshll.u32 %s1240_s15, 3  ;;  %vm147_vm0 = vcmask (!%p631_p7), 386048   ;;  %v716_v0 = vmov (!%p631_p7), 0.0  }
  0x12   : > { %s763_s20 = scalar_lea.vmem %s1226_s1, %s630_s16  ;;  %s768_s23 = scalar_lea.vmem %s1225_s0, %s629_s17  ;;  %148 = vst.msk [vmem:[#allocation2] sm:$0x3] (!%p631_p7), %vm147_vm0, %v716_v0 }
  0x13   : > { %146 = sbr.rel (%p631_p7) target bundleno = 26 (0x1a), region = 28 }
  0x1a PF: > { %v149_v1 = vld [vmem:[%s768_s23] sm:$0xff]  ;;  %v150_v2 = vld [vmem:[%s768_s23 + $0x8] sm:$0xff]  ;;  %v151_v3 = vld [vmem:[%s768_s23 + $0x10] sm:$0xff]  ;;  %vm214_vm1 = vcmask 392192   ;;  %vm545_vm2 = vcmask 1040384   ;;  %vm548_vm3 = vcmask 386048  }
  0x1b   : > { %v215_v4 = vsel %vm214_vm1, %v149_v1, 0.0  ;;  %v216_v5 = vsel %vm214_vm1, %v150_v2, 0.0  ;;  %v218_v6 = vsel %vm214_vm1, %v151_v3, 0.0  ;;  %v152_v7 = vld [vmem:[%s768_s23 + $0x18] sm:$0xff]  ;;  %v153_v10 = vld [vmem:[%s768_s23 + $0x20] sm:$0xff]  ;;  %v154_v13 = vld [vmem:[%s768_s23 + $0x28] sm:$0xff]  ;;  %v348_v55 = vmul.f32 %v149_v1, %v149_v1 }
  0x1c   : > { %v217_v8 = vadd.f32 %v216_v5, %v215_v4  ;;  %v220_v9 = vsel %vm214_vm1, %v152_v7, 0.0  ;;  %v222_v12 = vsel %vm214_vm1, %v153_v10, 0.0  ;;  %v224_v15 = vsel %vm214_vm1, %v154_v13, 0.0  ;;  %v784_v16 = vld [vmem:[%s768_s23 + $0x30] sm:$0xff]  ;;  %v789_v19 = vld [vmem:[%s768_s23 + $0x38] sm:$0xff]  ;;  %v794_v22 = vld [vmem:[%s768_s23 + $0x40] sm:$0xff] }
  0x1d   : > { %v226_v18 = vsel %vm214_vm1, %v784_v16, 0.0  ;;  %v228_v21 = vsel %vm214_vm1, %v789_v19, 0.0  ;;  %v230_v24 = vsel %vm214_vm1, %v794_v22, 0.0  ;;  %v799_v25 = vld [vmem:[%s768_s23 + $0x48] sm:$0xff]  ;;  %v804_v28 = vld [vmem:[%s768_s23 + $0x50] sm:$0xff]  ;;  %v809_v31 = vld [vmem:[%s768_s23 + $0x58] sm:$0xff]  ;;  %v349_v56 = vmul.f32 %v150_v2, %v150_v2 }
  0x1e   : > { %v219_v11 = vadd.f32 %v218_v6, %v217_v8  ;;  %v232_v27 = vsel %vm214_vm1, %v799_v25, 0.0  ;;  %v234_v30 = vsel %vm214_vm1, %v804_v28, 0.0  ;;  %v236_v33 = vsel %vm214_vm1, %v809_v31, 0.0  ;;  %v814_v34 = vld [vmem:[%s768_s23 + $0x60] sm:$0xff]  ;;  %v819_v37 = vld [vmem:[%s768_s23 + $0x68] sm:$0xff]  ;;  %v824_v40 = vld [vmem:[%s768_s23 + $0x70] sm:$0xff] }
  0x1f   : > { %v238_v36 = vsel %vm214_vm1, %v814_v34, 0.0  ;;  %v240_v39 = vsel %vm214_vm1, %v819_v37, 0.0  ;;  %v242_v42 = vsel %vm214_vm1, %v824_v40, 0.0  ;;  %v829_v43 = vld [vmem:[%s768_s23 + $0x78] sm:$0xff]  ;;  %v834_v46 = vld [vmem:[%s768_s23 + $0x80] sm:$0xff]  ;;  %v839_v49 = vld [vmem:[%s768_s23 + $0x88] sm:$0xff]  ;;  %v350_v59 = vmul.f32 %v151_v3, %v151_v3 }
  0x20   : > { %v221_v14 = vadd.f32 %v220_v9, %v219_v11  ;;  %v244_v45 = vsel %vm214_vm1, %v829_v43, 0.0  ;;  %v246_v48 = vsel %vm214_vm1, %v834_v46, 0.0  ;;  %v248_v51 = vsel %vm214_vm1, %v839_v49, 0.0  ;;  %v844_v52 = vld [vmem:[%s768_s23 + $0x90] sm:$0xff]  ;;  %v849_v57 = vld [vmem:[%s768_s23 + $0x98] sm:$0xff]  ;;  %v854_v62 = vld [vmem:[%s768_s23 + $0xa0] sm:$0xff] }
  0x21   : > { %v250_v54 = vsel %vm214_vm1, %v844_v52, 0.0  ;;  %v252_v60 = vsel %vm214_vm1, %v849_v57, 0.0  ;;  %v351_v61 = vmul.f32 %v152_v7, %v152_v7  ;;  %v254_v0 = vsel %vm214_vm1, %v854_v62, 0.0  ;;  %v861_v5 = vld [vmem:[%s768_s23 + $0xa8] sm:$0xff]  ;;  %p632_p8 = scmp.ne.s32.totalorder %s698_s6, 1 }
  0x22   : > { %v223_v17 = vadd.f32 %v222_v12, %v221_v14  ;;  %v352_v4 = vmul.f32 %v153_v10, %v153_v10  ;;  %v412_v1 = vsel %vm214_vm1, %v348_v55, 0.0  ;;  %v413_v2 = vsel %vm214_vm1, %v349_v56, 0.0  ;;  %v868_v12 = vld [vmem:[%s768_s23 + $0xb0] sm:$0xff]  ;;  %v916_v56 = vld [vmem:[%s768_s23 + $0xe0] sm:$0xff] }
  0x23   : > { %v414_v6 = vadd.f32 %v413_v2, %v412_v1  ;;  %v415_v8 = vsel %vm214_vm1, %v350_v59, 0.0  ;;  %v256_v7 = vsel %vm214_vm1, %v861_v5, 0.0  ;;  %v353_v9 = vmul.f32 %v154_v13, %v154_v13 }
  0x24   : > { %v225_v20 = vadd.f32 %v224_v15, %v223_v17  ;;  %v417_v11 = vsel %vm214_vm1, %v351_v61, 0.0  ;;  %v258_v15 = vsel %vm214_vm1, %v868_v12, 0.0  ;;  %v354_v17 = vmul.f32 %v784_v16, %v784_v16 }
  0x25   : > { %v416_v14 = vadd.f32 %v415_v8, %v414_v6  ;;  %v361_v1 = vmul.f32 %v819_v37, %v819_v37 }
  0x26   : > { %v227_v23 = vadd.f32 %v226_v18, %v225_v20  ;;  %v419_v18 = vsel %vm214_vm1, %v352_v4, 0.0  ;;  %v876_v20 = vld [vmem:[%s768_s23 + $0xb8] sm:$0xff] }
  0x27   : > { %v260_v13 = vsel %vm214_vm1, %v876_v20, 0.0 }
  0x28   : > { %v229_v26 = vadd.f32 %v228_v21, %v227_v23  ;;  %v418_v23 = vadd.f32 %v417_v11, %v416_v14  ;;  %v940_v11 = vld [vmem:[%s768_s23 + $0xf8] sm:$0xff] }
  0x29   : > { %v276_v37 = vsel %vm214_vm1, %v940_v11, 0.0 }
  0x2a   : > { %v231_v29 = vadd.f32 %v230_v24, %v229_v26  ;;  %v355_v24 = vmul.f32 %v789_v19, %v789_v19  ;;  %v421_v26 = vsel %vm214_vm1, %v353_v9, 0.0 }
  0x2c   : > { %v233_v32 = vadd.f32 %v232_v27, %v231_v29  ;;  %v884_v27 = vld [vmem:[%s768_s23 + $0xc0] sm:$0xff] }
  0x2d   : > { %v262_v16 = vsel %vm214_vm1, %v884_v27, 0.0 }
  0x2e   : > { %v235_v35 = vadd.f32 %v234_v30, %v233_v32  ;;  %v420_v30 = vadd.f32 %v419_v18, %v418_v23  ;;  %v356_v32 = vmul.f32 %v794_v22, %v794_v22  ;;  %v948_v18 = vld [vmem:[%s768_s23 + $0x100] sm:$0xff] }
  0x30   : > { %v237_v38 = vadd.f32 %v236_v33, %v235_v35  ;;  %v423_v33 = vsel %vm214_vm1, %v354_v17, 0.0  ;;  %v892_v35 = vld [vmem:[%s768_s23 + $0xc8] sm:$0xff]  ;;  %v437_v17 = vsel %vm214_vm1, %v361_v1, 0.0 }
  0x31   : > { %v264_v19 = vsel %vm214_vm1, %v892_v35, 0.0 }
  0x32   : > { %v239_v41 = vadd.f32 %v238_v36, %v237_v38  ;;  %v422_v38 = vadd.f32 %v421_v26, %v420_v30  ;;  %v956_v26 = vld [vmem:[%s768_s23 + $0x108] sm:$0xff] }
  0x34   : > { %v241_v44 = vadd.f32 %v240_v39, %v239_v41  ;;  %v357_v39 = vmul.f32 %v799_v25, %v799_v25  ;;  %v425_v41 = vsel %vm214_vm1, %v355_v24, 0.0 }
  0x36   : > { %v243_v47 = vadd.f32 %v242_v42, %v241_v44  ;;  %v900_v42 = vld [vmem:[%s768_s23 + $0xd0] sm:$0xff]  ;;  %v429_v55 = vsel %vm214_vm1, %v357_v39, 0.0 }
  0x37   : > { %v266_v22 = vsel %vm214_vm1, %v900_v42, 0.0 }
  0x38   : > { %v245_v50 = vadd.f32 %v244_v45, %v243_v47  ;;  %v424_v45 = vadd.f32 %v423_v33, %v422_v38  ;;  %v358_v47 = vmul.f32 %v804_v28, %v804_v28  ;;  %v270_v28 = vsel %vm214_vm1, %v916_v56, 0.0  ;;  %v964_v33 = vld [vmem:[%s768_s23 + $0x110] sm:$0xff] }
  0x3a   : > { %v247_v53 = vadd.f32 %v246_v48, %v245_v50  ;;  %v427_v48 = vsel %vm214_vm1, %v356_v32, 0.0  ;;  %v908_v50 = vld [vmem:[%s768_s23 + $0xd8] sm:$0xff]  ;;  %v431_v61 = vsel %vm214_vm1, %v358_v47, 0.0 }
  0x3b   : > { %v268_v25 = vsel %vm214_vm1, %v908_v50, 0.0 }
  0x3c   : > { %v249_v58 = vadd.f32 %v248_v51, %v247_v53  ;;  %v426_v53 = vadd.f32 %v425_v41, %v424_v45  ;;  %v972_v41 = vld [vmem:[%s768_s23 + $0x118] sm:$0xff] }
  0x3e   : > { %v251_v63 = vadd.f32 %v250_v54, %v249_v58  ;;  %v359_v54 = vmul.f32 %v809_v31, %v809_v31  ;;  %v428_v59 = vadd.f32 %v427_v48, %v426_v53  ;;  %v980_v48 = vld [vmem:[%s768_s23 + $0x120] sm:$0xff] }
  0x40   : > { %v253_v3 = vadd.f32 %v252_v60, %v251_v63  ;;  %v360_v60 = vmul.f32 %v814_v34, %v814_v34  ;;  %v924_v63 = vld [vmem:[%s768_s23 + $0xe8] sm:$0xff]  ;;  %v430_v4 = vadd.f32 %v429_v55, %v428_v59  ;;  %v433_v2 = vsel %vm214_vm1, %v359_v54, 0.0 }
  0x41   : > { %v272_v31 = vsel %vm214_vm1, %v924_v63, 0.0  ;;  %v988_v55 = vld [vmem:[%s768_s23 + $0x128] sm:$0xff] }
  0x42   : > { %v255_v10 = vadd.f32 %v254_v0, %v253_v3  ;;  %v932_v3 = vld [vmem:[%s768_s23 + $0xf0] sm:$0xff]  ;;  %v432_v8 = vadd.f32 %v431_v61, %v430_v4  ;;  %v435_v9 = vsel %vm214_vm1, %v360_v60, 0.0 }
  0x43   : > { %v274_v34 = vsel %vm214_vm1, %v932_v3, 0.0  ;;  %v996_v61 = vld [vmem:[%s768_s23 + $0x130] sm:$0xff] }
  0x44   : > { %v257_v21 = vadd.f32 %v256_v7, %v255_v10  ;;  %v362_v7 = vmul.f32 %v824_v40, %v824_v40  ;;  %v434_v14 = vadd.f32 %v433_v2, %v432_v8  ;;  %v278_v40 = vsel %vm214_vm1, %v948_v18, 0.0  ;;  %v1004_v2 = vld [vmem:[%s768_s23 + $0x138] sm:$0xff] }
  0x46   : > { %v259_v29 = vadd.f32 %v258_v15, %v257_v21  ;;  %v363_v15 = vmul.f32 %v829_v43, %v829_v43  ;;  %v436_v23 = vadd.f32 %v435_v9, %v434_v14  ;;  %v439_v24 = vsel %vm214_vm1, %v362_v7, 0.0  ;;  %v1012_v9 = vld [vmem:[%s768_s23 + $0x140] sm:$0xff] }
  0x47   : > { %v280_v43 = vsel %vm214_vm1, %v956_v26, 0.0 }
  0x48   : > { %v261_v36 = vadd.f32 %v260_v13, %v259_v29  ;;  %v364_v13 = vmul.f32 %v834_v46, %v834_v46  ;;  %v438_v30 = vadd.f32 %v437_v17, %v436_v23  ;;  %v441_v32 = vsel %vm214_vm1, %v363_v15, 0.0  ;;  %v1020_v17 = vld [vmem:[%s768_s23 + $0x148] sm:$0xff] }
  0x49   : > { %v282_v46 = vsel %vm214_vm1, %v964_v33, 0.0 }
  0x4a   : > { %v263_v44 = vadd.f32 %v262_v16, %v261_v36  ;;  %v365_v16 = vmul.f32 %v839_v49, %v839_v49  ;;  %v440_v38 = vadd.f32 %v439_v24, %v438_v30  ;;  %v443_v39 = vsel %vm214_vm1, %v364_v13, 0.0  ;;  %v1028_v24 = vld [vmem:[%s768_s23 + $0x150] sm:$0xff] }
  0x4b   : > { %v284_v49 = vsel %vm214_vm1, %v972_v41, 0.0 }
  0x4c   : > { %v265_v51 = vadd.f32 %v264_v19, %v263_v44  ;;  %v366_v19 = vmul.f32 %v844_v52, %v844_v52  ;;  %v442_v45 = vadd.f32 %v441_v32, %v440_v38  ;;  %v445_v47 = vsel %vm214_vm1, %v365_v16, 0.0  ;;  %v1036_v32 = vld [vmem:[%s768_s23 + $0x158] sm:$0xff] }
  0x4d   : > { %v286_v52 = vsel %vm214_vm1, %v980_v48, 0.0 }
  0x4e   : > { %v267_v58 = vadd.f32 %v266_v22, %v265_v51  ;;  %v367_v22 = vmul.f32 %v849_v57, %v849_v57  ;;  %v444_v53 = vadd.f32 %v443_v39, %v442_v45  ;;  %v447_v54 = vsel %vm214_vm1, %v366_v19, 0.0  ;;  %v1044_v39 = vld [vmem:[%s768_s23 + $0x160] sm:$0xff] }
  0x4f   : > { %v288_v57 = vsel %vm214_vm1, %v988_v55, 0.0 }
  0x50   : > { %v269_v0 = vadd.f32 %v268_v25, %v267_v58  ;;  %v368_v25 = vmul.f32 %v854_v62, %v854_v62  ;;  %v446_v59 = vadd.f32 %v445_v47, %v444_v53  ;;  %v449_v60 = vsel %vm214_vm1, %v367_v22, 0.0  ;;  %v1052_v47 = vld [vmem:[%s768_s23 + $0x168] sm:$0xff] }
  0x51   : > { %v290_v62 = vsel %vm214_vm1, %v996_v61, 0.0 }
  0x52   : > { %v271_v6 = vadd.f32 %v270_v28, %v269_v0  ;;  %v369_v28 = vmul.f32 %v861_v5, %v861_v5  ;;  %v448_v4 = vadd.f32 %v447_v54, %v446_v59  ;;  %v451_v1 = vsel %vm214_vm1, %v368_v25, 0.0  ;;  %v1060_v54 = vld [vmem:[%s768_s23 + $0x170] sm:$0xff] }
  0x53   : > { %v292_v5 = vsel %vm214_vm1, %v1004_v2, 0.0 }
  0x54   : > { %v273_v10 = vadd.f32 %v272_v31, %v271_v6  ;;  %v370_v31 = vmul.f32 %v868_v12, %v868_v12  ;;  %v450_v8 = vadd.f32 %v449_v60, %v448_v4  ;;  %v453_v7 = vsel %vm214_vm1, %v369_v28, 0.0  ;;  %v1068_v60 = vld [vmem:[%s768_s23 + $0x178] sm:$0xff] }
  0x55   : > { %v294_v12 = vsel %vm214_vm1, %v1012_v9, 0.0 }
  0x56   : > { %v275_v21 = vadd.f32 %v274_v34, %v273_v10  ;;  %v371_v34 = vmul.f32 %v876_v20, %v876_v20  ;;  %v452_v14 = vadd.f32 %v451_v1, %v450_v8  ;;  %v455_v15 = vsel %vm214_vm1, %v370_v31, 0.0  ;;  %v1076_v1 = vld [vmem:[%s768_s23 + $0x180] sm:$0xff] }
  0x57   : > { %v296_v20 = vsel %vm214_vm1, %v1020_v17, 0.0 }
  0x58   : > { %v277_v29 = vadd.f32 %v276_v37, %v275_v21  ;;  %v372_v37 = vmul.f32 %v884_v27, %v884_v27  ;;  %v454_v23 = vadd.f32 %v453_v7, %v452_v14  ;;  %v457_v13 = vsel %vm214_vm1, %v371_v34, 0.0  ;;  %v1084_v7 = vld [vmem:[%s768_s23 + $0x188] sm:$0xff] }
  0x59   : > { %v298_v27 = vsel %vm214_vm1, %v1028_v24, 0.0 }
  0x5a   : > { %v279_v36 = vadd.f32 %v278_v40, %v277_v29  ;;  %v373_v40 = vmul.f32 %v892_v35, %v892_v35  ;;  %v456_v30 = vadd.f32 %v455_v15, %v454_v23  ;;  %v459_v16 = vsel %vm214_vm1, %v372_v37, 0.0  ;;  %v1092_v15 = vld [vmem:[%s768_s23 + $0x190] sm:$0xff] }
  0x5b   : > { %v300_v35 = vsel %vm214_vm1, %v1036_v32, 0.0 }
  0x5c   : > { %v281_v44 = vadd.f32 %v280_v43, %v279_v36  ;;  %v374_v43 = vmul.f32 %v900_v42, %v900_v42  ;;  %v458_v38 = vadd.f32 %v457_v13, %v456_v30  ;;  %v461_v19 = vsel %vm214_vm1, %v373_v40, 0.0  ;;  %v1100_v13 = vld [vmem:[%s768_s23 + $0x198] sm:$0xff] }
  0x5d   : > { %v302_v42 = vsel %vm214_vm1, %v1044_v39, 0.0 }
  0x5e   : > { %v283_v51 = vadd.f32 %v282_v46, %v281_v44  ;;  %v375_v46 = vmul.f32 %v908_v50, %v908_v50  ;;  %v460_v45 = vadd.f32 %v459_v16, %v458_v38  ;;  %v463_v22 = vsel %vm214_vm1, %v374_v43, 0.0  ;;  %v1108_v16 = vld [vmem:[%s768_s23 + $0x1a0] sm:$0xff] }
  0x5f   : > { %v304_v50 = vsel %vm214_vm1, %v1052_v47, 0.0 }
  0x60   : > { %v285_v58 = vadd.f32 %v284_v49, %v283_v51  ;;  %v376_v49 = vmul.f32 %v916_v56, %v916_v56  ;;  %v462_v53 = vadd.f32 %v461_v19, %v460_v45  ;;  %v465_v25 = vsel %vm214_vm1, %v375_v46, 0.0 }
  0x61   : > { %v306_v56 = vsel %vm214_vm1, %v1060_v54, 0.0 }
  0x62   : > { %v287_v0 = vadd.f32 %v286_v52, %v285_v58  ;;  %v377_v52 = vmul.f32 %v924_v63, %v924_v63  ;;  %v464_v59 = vadd.f32 %v463_v22, %v462_v53  ;;  %v467_v28 = vsel %vm214_vm1, %v376_v49, 0.0 }
  0x63   : > { %v308_v63 = vsel %vm214_vm1, %v1068_v60, 0.0 }
  0x64   : > { %v289_v6 = vadd.f32 %v288_v57, %v287_v0  ;;  %v378_v57 = vmul.f32 %v932_v3, %v932_v3  ;;  %v466_v4 = vadd.f32 %v465_v25, %v464_v59  ;;  %v469_v31 = vsel %vm214_vm1, %v377_v52, 0.0  ;;  %v1130_v25 = vld [vmem:[%s768_s23 + $0x1b0] sm:$0xff] }
  0x65   : > { %v310_v3 = vsel %vm214_vm1, %v1076_v1, 0.0  ;;  %v387_v52 = vmul.f32 %v1004_v2, %v1004_v2 }
  0x66   : > { %v291_v10 = vadd.f32 %v290_v62, %v289_v6  ;;  %v379_v62 = vmul.f32 %v940_v11, %v940_v11  ;;  %v468_v8 = vadd.f32 %v467_v28, %v466_v4  ;;  %v471_v34 = vsel %vm214_vm1, %v378_v57, 0.0  ;;  %v204_v4 = vld [vmem:[%s768_s23 + $0x1b8] sm:$0xff] }
  0x67   : > { %v312_v11 = vsel %vm214_vm1, %v1084_v7, 0.0  ;;  %v388_v57 = vmul.f32 %v1012_v9, %v1012_v9  ;;  %v489_v2 = vsel %vm214_vm1, %v387_v52, 0.0  ;;  %v400_v52 = vmul.f32 %v1108_v16, %v1108_v16 }
  0x68   : > { %v293_v21 = vadd.f32 %v292_v5, %v291_v10  ;;  %v380_v5 = vmul.f32 %v948_v18, %v948_v18  ;;  %v470_v14 = vadd.f32 %v469_v31, %v468_v8  ;;  %v473_v37 = vsel %vm214_vm1, %v379_v62, 0.0 }
  0x69   : > { %v314_v18 = vsel %vm214_vm1, %v1092_v15, 0.0  ;;  %v324_v31 = vsel %vm214_vm1, %v204_v4, 0.0  ;;  %v491_v8 = vsel %vm214_vm1, %v388_v57, 0.0 }
  0x6a   : > { %v295_v29 = vadd.f32 %v294_v12, %v293_v21  ;;  %v381_v12 = vmul.f32 %v956_v26, %v956_v26  ;;  %v472_v23 = vadd.f32 %v471_v34, %v470_v14  ;;  %v475_v40 = vsel %vm214_vm1, %v380_v5, 0.0 }
  0x6b   : > { %v316_v26 = vsel %vm214_vm1, %v1100_v13, 0.0 }
  0x6c   : > { %v297_v36 = vadd.f32 %v296_v20, %v295_v29  ;;  %v382_v20 = vmul.f32 %v964_v33, %v964_v33  ;;  %v474_v30 = vadd.f32 %v473_v37, %v472_v23  ;;  %v477_v43 = vsel %vm214_vm1, %v381_v12, 0.0 }
  0x6d   : > { %v318_v33 = vsel %vm214_vm1, %v1108_v16, 0.0  ;;  %v393_v37 = vmul.f32 %v1052_v47, %v1052_v47  ;;  %v207_v47 = vld [vmem:[%s768_s23 + $0x1d0] sm:$0xff] }
  0x6e   : > { %v299_v44 = vadd.f32 %v298_v27, %v297_v36  ;;  %v383_v27 = vmul.f32 %v972_v41, %v972_v41  ;;  %v476_v38 = vadd.f32 %v475_v40, %v474_v30  ;;  %v479_v46 = vsel %vm214_vm1, %v382_v20, 0.0 }
  0x6f   : > { %v385_v41 = vmul.f32 %v988_v55, %v988_v55  ;;  %v394_v40 = vmul.f32 %v1060_v54, %v1060_v54  ;;  %v395_v30 = vmul.f32 %v1068_v60, %v1068_v60  ;;  %v208_v60 = vld [vmem:[%s768_s23 + $0x1d8] sm:$0xff] }
  0x70   : > { %v301_v51 = vadd.f32 %v300_v35, %v299_v44  ;;  %v384_v35 = vmul.f32 %v980_v48, %v980_v48  ;;  %v478_v44 = vadd.f32 %v477_v43, %v476_v38  ;;  %v481_v45 = vsel %vm214_vm1, %v383_v27, 0.0 }
  0x71   : > { %v386_v48 = vmul.f32 %v996_v61, %v996_v61  ;;  %v485_v55 = vsel %vm214_vm1, %v385_v41, 0.0  ;;  %v396_v38 = vmul.f32 %v1076_v1, %v1076_v1  ;;  %v332_v41 = vsel %vm214_vm1, %v208_v60, 0.0 }
  0x72   : > { %v303_v58 = vadd.f32 %v302_v42, %v301_v51  ;;  %v1119_v42 = vld [vmem:[%s768_s23 + $0x1a8] sm:$0xff]  ;;  %v480_v22 = vadd.f32 %v479_v46, %v478_v44  ;;  %v483_v53 = vsel %vm214_vm1, %v384_v35, 0.0  ;;  %v397_v35 = vmul.f32 %v1084_v7, %v1084_v7  ;;  %v209_v7 = vld [vmem:[%s768_s23 + $0x1e0] sm:$0xff] }
  0x73   : > { %v320_v51 = vsel %vm214_vm1, %v1119_v42, 0.0  ;;  %v487_v61 = vsel %vm214_vm1, %v386_v48, 0.0  ;;  %v505_v46 = vsel %vm214_vm1, %v395_v30, 0.0 }
  0x74   : > { %v305_v0 = vadd.f32 %v304_v50, %v303_v58  ;;  %v482_v50 = vadd.f32 %v481_v45, %v480_v22  ;;  %v398_v45 = vmul.f32 %v1092_v15, %v1092_v15  ;;  %v399_v22 = vmul.f32 %v1100_v13, %v1100_v13  ;;  %v210_v13 = vld [vmem:[%s768_s23 + $0x1e8] sm:$0xff] }
  0x76   : > { %v307_v6 = vadd.f32 %v306_v56, %v305_v0  ;;  %v484_v59 = vadd.f32 %v483_v53, %v482_v50  ;;  %v322_v56 = vsel %vm214_vm1, %v1130_v25, 0.0  ;;  %v389_v0 = vmul.f32 %v1020_v17, %v1020_v17  ;;  %v205_v17 = vld [vmem:[%s768_s23 + $0x1c0] sm:$0xff] }
  0x77   : > { %v326_v14 = vsel %vm214_vm1, %v205_v17, 0.0  ;;  %v334_v50 = vsel %vm214_vm1, %v209_v7, 0.0 }
  0x78   : > { %v309_v10 = vadd.f32 %v308_v63, %v307_v6  ;;  %v486_v28 = vadd.f32 %v485_v55, %v484_v59  ;;  %v390_v6 = vmul.f32 %v1028_v24, %v1028_v24  ;;  %v493_v5 = vsel %vm214_vm1, %v389_v0, 0.0 }
  0x79   : > { %v511_v55 = vsel %vm214_vm1, %v398_v45, 0.0  ;;  %v513_v59 = vsel %vm214_vm1, %v399_v22, 0.0  ;;  %v515_v0 = vsel %vm214_vm1, %v400_v52, 0.0 }
  0x7a   : > { %v311_v21 = vadd.f32 %v310_v3, %v309_v10  ;;  %v488_v62 = vadd.f32 %v487_v61, %v486_v28  ;;  %v391_v3 = vmul.f32 %v1036_v32, %v1036_v32  ;;  %v495_v12 = vsel %vm214_vm1, %v390_v6, 0.0  ;;  %v206_v32 = vld [vmem:[%s768_s23 + $0x1c8] sm:$0xff] }
  0x7b   : > { %v328_v20 = vsel %vm214_vm1, %v206_v32, 0.0  ;;  %v336_v61 = vsel %vm214_vm1, %v210_v13, 0.0  ;;  %v402_v28 = vmul.f32 %v1130_v25, %v1130_v25 }
  0x7c   : > { %v313_v29 = vadd.f32 %v312_v11, %v311_v21  ;;  %v490_v9 = vadd.f32 %v489_v2, %v488_v62  ;;  %v392_v11 = vmul.f32 %v1044_v39, %v1044_v39  ;;  %v497_v21 = vsel %vm214_vm1, %v391_v3, 0.0  ;;  %v211_v62 = vld [vmem:[%s768_s23 + $0x1f0] sm:$0xff] }
  0x7d   : > { %v403_v2 = vmul.f32 %v204_v4, %v204_v4  ;;  %v338_v6 = vsel %vm214_vm1, %v211_v62, 0.0  ;;  %v406_v4 = vmul.f32 %v207_v47, %v207_v47 }
  0x7e   : > { %v315_v36 = vadd.f32 %v314_v18, %v313_v29  ;;  %v492_v10 = vadd.f32 %v491_v8, %v490_v9  ;;  %v499_v29 = vsel %vm214_vm1, %v392_v11, 0.0  ;;  %v404_v8 = vmul.f32 %v205_v17, %v205_v17 }
  0x7f   : > { %v519_v9 = vsel %vm214_vm1, %v402_v28, 0.0 }
  0x80   : > { %v317_v19 = vadd.f32 %v316_v26, %v315_v36  ;;  %v494_v24 = vadd.f32 %v493_v5, %v492_v10  ;;  %v501_v26 = vsel %vm214_vm1, %v393_v37, 0.0  ;;  %v330_v36 = vsel %vm214_vm1, %v207_v47, 0.0  ;;  %v212_v10 = vld [vmem:[%s768_s23 + $0x1f8] sm:$0xff] }
  0x81   : > { %v405_v5 = vmul.f32 %v206_v32, %v206_v32  ;;  %v340_v11 = vsel %vm214_vm1, %v212_v10, 0.0  ;;  %v407_v37 = vmul.f32 %v208_v60, %v208_v60 }
  0x82   : > { %v319_v49 = vadd.f32 %v318_v33, %v317_v19  ;;  %v496_v18 = vadd.f32 %v495_v12, %v494_v24  ;;  %v503_v33 = vsel %vm214_vm1, %v394_v40, 0.0  ;;  %v523_v12 = vsel %vm214_vm1, %v404_v8, 0.0 }
  0x83   : > { %v409_v40 = vmul.f32 %v210_v13, %v210_v13 }
  0x84   : > { %v321_v58 = vadd.f32 %v320_v51, %v319_v49  ;;  %v498_v39 = vadd.f32 %v497_v21, %v496_v18  ;;  %v507_v49 = vsel %vm214_vm1, %v396_v38, 0.0  ;;  %v509_v51 = vsel %vm214_vm1, %v397_v35, 0.0 }
  0x85   : > { %v525_v21 = vsel %vm214_vm1, %v405_v5, 0.0  ;;  %v408_v18 = vmul.f32 %v209_v7, %v209_v7 }
  0x86   : > { %v323_v63 = vadd.f32 %v322_v56, %v321_v58  ;;  %v500_v43 = vadd.f32 %v499_v29, %v498_v39  ;;  %v401_v58 = vmul.f32 %v1119_v42, %v1119_v42  ;;  %v529_v29 = vsel %vm214_vm1, %v407_v37, 0.0 }
  0x87   : > { %v531_v47 = vsel %vm214_vm1, %v408_v18, 0.0 }
  0x88   : > { %v325_v34 = vadd.f32 %v324_v31, %v323_v63  ;;  %v502_v54 = vadd.f32 %v501_v26, %v500_v43  ;;  %v517_v63 = vsel %vm214_vm1, %v401_v58, 0.0  ;;  %v410_v26 = vmul.f32 %v211_v62, %v211_v62 }
  0x89   : > { %v411_v43 = vmul.f32 %v212_v10, %v212_v10 }
  0x8a   : > { %v327_v23 = vadd.f32 %v326_v14, %v325_v34  ;;  %v504_v44 = vadd.f32 %v503_v33, %v502_v54  ;;  %v521_v34 = vsel %vm214_vm1, %v403_v2, 0.0  ;;  %v535_v54 = vsel %vm214_vm1, %v410_v26, 0.0 }
  0x8c   : > { %v329_v27 = vadd.f32 %v328_v20, %v327_v23  ;;  %v506_v1 = vadd.f32 %v505_v46, %v504_v44  ;;  %v527_v20 = vsel %vm214_vm1, %v406_v4, 0.0  ;;  %v537_v46 = vsel %vm214_vm1, %v411_v43, 0.0 }
  0x8e   : > { %v331_v19 = vadd.f32 %v330_v36, %v329_v27  ;;  %v508_v53 = vadd.f32 %v507_v49, %v506_v1  ;;  %v533_v36 = vsel %vm214_vm1, %v409_v40, 0.0 }
  0x90   : > { %v333_v48 = vadd.f32 %v332_v41, %v331_v19  ;;  %v510_v15 = vadd.f32 %v509_v51, %v508_v53  ;;  %v213_v53 = vld [vmem:[#allocation2] sm:$0x3] }
  0x92   : > { %v335_v56 = vadd.f32 %v334_v50, %v333_v48  ;;  %v512_v57 = vadd.f32 %v511_v55, %v510_v15 }
  0x94   : > { %v514_v16 = vadd.f32 %v513_v59, %v512_v57  ;;  %v337_v31 = vadd.f32 %v336_v61, %v335_v56 }
  0x96   : > { %v516_v42 = vadd.f32 %v515_v0, %v514_v16  ;;  %v339_v25 = vadd.f32 %v338_v6, %v337_v31 }
  0x98   : > { %v518_v3 = vadd.f32 %v517_v63, %v516_v42  ;;  %v341_v23 = vadd.f32 %v340_v11, %v339_v25 }
  0x9a   : > { %v520_v14 = vadd.f32 %v519_v9, %v518_v3  ;;  %v342_v39 = vrot.slane %v341_v23, 4 }
  0x9c   : > { %v522_v24 = vadd.f32 %v521_v34, %v520_v14  ;;  %v343_v38 = vadd.f32 %v342_v39, %v341_v23 }
  0x9e   : > { %v524_v17 = vadd.f32 %v523_v12, %v522_v24  ;;  %v344_v60 = vrot.slane %v343_v38, 2 }
  0xa0   : > { %v526_v32 = vadd.f32 %v525_v21, %v524_v17  ;;  %v345_v41 = vadd.f32 %v344_v60, %v343_v38 }
  0xa2   : > { %v528_v30 = vadd.f32 %v527_v20, %v526_v32  ;;  %v346_v1 = vrot.slane %v345_v41, 1 }
  0xa4   : > { %v530_v27 = vadd.f32 %v529_v29, %v528_v30  ;;  %v347_v7 = vadd.f32 %v346_v1, %v345_v41 }
  0xa6   : > { %v532_v33 = vadd.f32 %v531_v47, %v530_v27 }
  0xa8   : > { %v534_v35 = vadd.f32 %v533_v36, %v532_v33 }
  0xaa   : > { %v536_v19 = vadd.f32 %v535_v54, %v534_v35 }
  0xac   : > { %v538_v44 = vadd.f32 %v537_v46, %v536_v19 }
  0xae   : > { %v539_v45 = vrot.slane %v538_v44, 4 }
  0xb0   : > { %v540_v49 = vadd.f32 %v539_v45, %v538_v44 }
  0xb2   : > { %v541_v22 = vrot.slane %v540_v49, 2 }
  0xb4   : > { %v542_v51 = vadd.f32 %v541_v22, %v540_v49 }
  0xb6   : > { %v543_v48 = vrot.slane %v542_v51, 1 }
  0xb7   : > { %553 = sbr.rel (%p632_p8) target bundleno = 198 (0xc6), region = 32 }
  0xb8   : > { %v544_v50 = vadd.f32 %v543_v48, %v542_v51 }
  0xba   : > { %v546_v52 = vsel %vm545_vm2, %v347_v7, %v544_v50 }
  0xbb   : > { %v547_v55 = vadd.f32 %v546_v52, %v213_v53 }
  0xbd   : > { %549 = vst.msk [vmem:[#allocation2] sm:$0x3] %vm548_vm3, %v547_v55 }
  0xc4   : > { %v554_v15 = vld [vmem:[#allocation2] sm:$0x3] }
  0xc5   : > { %555 = vst.msk [vmem:[%s763_s20] sm:$0x3] %vm548_vm3, %v554_v15 }
  0xc6 PF: > { %s11_s10 = sadd.s32 1, %s714_s10   ;;  %s1227_s6 = smov %s706_s8 }
  0xc7   : > { %p8_p9 = scmp.ge.s32.totalorder %s11_s10, 6   ;;  %s1228_s7 = smov %s710_s9 }
  0xc8   : > { %s1229_s8 = smov %s1232_s11  ;;  %s1230_s9 = smov %s1236_s12 }
  0xc9   :  { %10 = sbr.rel (!%p8_p9) target bundleno = 3 (0x3), region = 62 }

// kernel: transition_forward.3
= control target key start
LH: loop header
LB: loop body
LE: loop exit
PB: predicated region body
PF: predicated region fallthrough
CT: control target
= control target key end

     0   :  { %8 = vsyncpa [#allocation4], 0  ;;  %s2867_s0 = inlined_call_operand.vmem [shape: f32[4,512,48], index: 0, kind: input, shape index: {}]   ;;  %s2868_s1 = inlined_call_operand.vmem [shape: f32[2,48], index: 1, kind: input, shape index: {}]   ;;  %s2869_s2 = inlined_call_operand.vmem [shape: bf16[48,128], index: 2, kind: input, shape index: {}]   ;;  %s2870_s3 = inlined_call_operand.hbm [shape: f32[512,128], index: 3, kind: output, shape index: {}]  }
   0x1   :  { %10 = vsyncpa [#allocation4 + $0x1], 0  ;;  %s2029_s12 = smov 0   ;;  %s2031_s13 = smov 0  }
   0x2   :  { %s2033_s14 = smov 0   ;;  %s2035_s15 = smov 0  }
   0x3 LB: > { %s1699_s16 = sadd.s32 4294967295, %s2004_s15   ;;  %s1700_s17 = sadd.s32 4294967294, %s2004_s15   ;;  %s2004_s15 = sphi %s2035_s15, %s2876_s15   ;;  %s2000_s14 = sphi %s2033_s14, %s2875_s14   ;;  %s1996_s13 = sphi %s2031_s13, %s2874_s13   ;;  %s1992_s12 = sphi %s2029_s12, %s2873_s12  }
   0x4   : > { %s2052_s18 = sadd.s32 1, %s2004_s15   ;;  %s23_s19 = sadd.s32 1, %s2000_s14 }
   0x5   : > { %s20_s20 = ssub.s32 %s2004_s15, %s2052_s18  ;;  %p30_p0 = scmp.ne.s32.totalorder %s2000_s14, %s1996_s13 }
   0x6   : > { %p21_p1 = scmp.eq.s32.totalorder %s20_s20, 0  ;;  %p31_p2 = scmp.eq.s32.totalorder %s2004_s15, 0 }
   0x7   : > { %p102_p3 = scmp.eq.s32.totalorder %s1699_s16, 1  ;;  %p107_p4 = scmp.ne.s32.totalorder %s1996_s13, %s1992_s12 }
   0x8   : > { %s2065_s21 = scalar_select %p21_p1, %s2000_s14, %s23_s19  }
   0x9   : > { %p32_p5 = por %p31_p2, %p30_p0  ;;  %p2067_p6 = por %p102_p3, %p30_p0 }
   0xa   : > { %p108_p7 = scmp.eq.s32.totalorder %s1700_s17, 1  ;;  %p1702_p9 = scmp.ge.s32.totalorder %s2004_s15, 2 }
   0xc   : > { %p2071_p8 = por %p108_p7, %p107_p4  ;;  %130 = sbr.rel (%p1702_p9) target bundleno = 87 (0x57), region = 24 }
  0x13   : > { %133 = sbr.rel (!%p32_p5) target bundleno = 87 (0x57), region = 28  ;;  %s135_s24 = sand.u32 (%p32_p5), 1, %s2000_s14  }
  0x14   : > { %s1831_s25 = sshll.u32 (%p32_p5), %s2004_s15, 8  ;;  %s1703_s26 = sshll.u32 (%p32_p5), %s135_s24, 10 }
  0x15   : > { %s2083_s29 = scalar_lea.vmem (%p32_p5), %s2867_s0, %s1831_s25  ;;  %s2088_s30 = scalar_lea.vmem (%p32_p5), [#allocation2], %s1703_s26 }
  0x16   : > { %v422_v0 = vld [vmem:[%s2083_s29] sm:$0xff] (%p32_p5)  ;;  %v424_v1 = vld [vmem:[%s2083_s29 + $0x8] sm:$0xff] (%p32_p5)  ;;  %v426_v2 = vld [vmem:[%s2083_s29 + $0x10] sm:$0xff] (%p32_p5) }
  0x17   : > { %423 = vst [vmem:[%s2088_s30] sm:$0xff] (%p32_p5), %v422_v0  ;;  %425 = vst [vmem:[%s2088_s30 + $0x8] sm:$0xff] (%p32_p5), %v424_v1  ;;  %v428_v3 = vld [vmem:[%s2083_s29 + $0x18] sm:$0xff] (%p32_p5)  ;;  %v430_v4 = vld [vmem:[%s2083_s29 + $0x20] sm:$0xff] (%p32_p5) }
  0x18   : > { %427 = vst [vmem:[%s2088_s30 + $0x10] sm:$0xff] (%p32_p5), %v426_v2  ;;  %v432_v5 = vld [vmem:[%s2083_s29 + $0x28] sm:$0xff] (%p32_p5)  ;;  %429 = vst [vmem:[%s2088_s30 + $0x18] sm:$0xff] (%p32_p5), %v428_v3  ;;  %v434_v6 = vld [vmem:[%s2083_s29 + $0x30] sm:$0xff] (%p32_p5) }
  0x19   : > { %431 = vst [vmem:[%s2088_s30 + $0x20] sm:$0xff] (%p32_p5), %v430_v4  ;;  %433 = vst [vmem:[%s2088_s30 + $0x28] sm:$0xff] (%p32_p5), %v432_v5  ;;  %v436_v7 = vld [vmem:[%s2083_s29 + $0x38] sm:$0xff] (%p32_p5)  ;;  %v438_v8 = vld [vmem:[%s2083_s29 + $0x40] sm:$0xff] (%p32_p5) }
  0x1a   : > { %435 = vst [vmem:[%s2088_s30 + $0x30] sm:$0xff] %v434_v6  ;;  %437 = vst [vmem:[%s2088_s30 + $0x38] sm:$0xff] %v436_v7  ;;  %v440_v9 = vld [vmem:[%s2083_s29 + $0x48] sm:$0xff]  ;;  %v442_v10 = vld [vmem:[%s2083_s29 + $0x50] sm:$0xff] }
  0x1b   : > { %439 = vst [vmem:[%s2088_s30 + $0x40] sm:$0xff] %v438_v8  ;;  %v444_v11 = vld [vmem:[%s2083_s29 + $0x58] sm:$0xff]  ;;  %441 = vst [vmem:[%s2088_s30 + $0x48] sm:$0xff] %v440_v9  ;;  %v446_v12 = vld [vmem:[%s2083_s29 + $0x60] sm:$0xff] }
  0x1c   : > { %443 = vst [vmem:[%s2088_s30 + $0x50] sm:$0xff] %v442_v10  ;;  %445 = vst [vmem:[%s2088_s30 + $0x58] sm:$0xff] %v444_v11  ;;  %v448_v13 = vld [vmem:[%s2083_s29 + $0x68] sm:$0xff]  ;;  %v450_v14 = vld [vmem:[%s2083_s29 + $0x70] sm:$0xff] }
  0x1d   : > { %447 = vst [vmem:[%s2088_s30 + $0x60] sm:$0xff] %v446_v12  ;;  %449 = vst [vmem:[%s2088_s30 + $0x68] sm:$0xff] %v448_v13  ;;  %v452_v15 = vld [vmem:[%s2083_s29 + $0x78] sm:$0xff]  ;;  %v454_v16 = vld [vmem:[%s2083_s29 + $0x80] sm:$0xff] }
  0x1e   : > { %451 = vst [vmem:[%s2088_s30 + $0x70] sm:$0xff] %v450_v14  ;;  %v456_v17 = vld [vmem:[%s2083_s29 + $0x88] sm:$0xff]  ;;  %453 = vst [vmem:[%s2088_s30 + $0x78] sm:$0xff] %v452_v15  ;;  %v458_v18 = vld [vmem:[%s2083_s29 + $0x90] sm:$0xff] }
  0x1f   : > { %455 = vst [vmem:[%s2088_s30 + $0x80] sm:$0xff] %v454_v16  ;;  %457 = vst [vmem:[%s2088_s30 + $0x88] sm:$0xff] %v456_v17  ;;  %v460_v19 = vld [vmem:[%s2083_s29 + $0x98] sm:$0xff]  ;;  %v462_v20 = vld [vmem:[%s2083_s29 + $0xa0] sm:$0xff] }
  0x20   : > { %459 = vst [vmem:[%s2088_s30 + $0x90] sm:$0xff] %v458_v18  ;;  %461 = vst [vmem:[%s2088_s30 + $0x98] sm:$0xff] %v460_v19  ;;  %v464_v21 = vld [vmem:[%s2083_s29 + $0xa8] sm:$0xff]  ;;  %v466_v22 = vld [vmem:[%s2083_s29 + $0xb0] sm:$0xff] }
  0x21   : > { %463 = vst [vmem:[%s2088_s30 + $0xa0] sm:$0xff] %v462_v20  ;;  %v468_v23 = vld [vmem:[%s2083_s29 + $0xb8] sm:$0xff]  ;;  %465 = vst [vmem:[%s2088_s30 + $0xa8] sm:$0xff] %v464_v21  ;;  %v470_v24 = vld [vmem:[%s2083_s29 + $0xc0] sm:$0xff] }
  0x22   : > { %467 = vst [vmem:[%s2088_s30 + $0xb0] sm:$0xff] %v466_v22  ;;  %469 = vst [vmem:[%s2088_s30 + $0xb8] sm:$0xff] %v468_v23  ;;  %v472_v25 = vld [vmem:[%s2083_s29 + $0xc8] sm:$0xff]  ;;  %v474_v26 = vld [vmem:[%s2083_s29 + $0xd0] sm:$0xff] }
  0x23   : > { %471 = vst [vmem:[%s2088_s30 + $0xc0] sm:$0xff] %v470_v24  ;;  %473 = vst [vmem:[%s2088_s30 + $0xc8] sm:$0xff] %v472_v25  ;;  %v476_v27 = vld [vmem:[%s2083_s29 + $0xd8] sm:$0xff]  ;;  %v478_v28 = vld [vmem:[%s2083_s29 + $0xe0] sm:$0xff] }
  0x24   : > { %475 = vst [vmem:[%s2088_s30 + $0xd0] sm:$0xff] %v474_v26  ;;  %v480_v29 = vld [vmem:[%s2083_s29 + $0xe8] sm:$0xff]  ;;  %477 = vst [vmem:[%s2088_s30 + $0xd8] sm:$0xff] %v476_v27  ;;  %v482_v30 = vld [vmem:[%s2083_s29 + $0xf0] sm:$0xff] }
  0x25   : > { %479 = vst [vmem:[%s2088_s30 + $0xe0] sm:$0xff] %v478_v28  ;;  %481 = vst [vmem:[%s2088_s30 + $0xe8] sm:$0xff] %v480_v29  ;;  %v484_v31 = vld [vmem:[%s2083_s29 + $0xf8] sm:$0xff]  ;;  %v486_v32 = vld [vmem:[%s2083_s29 + $0x200] sm:$0xff] }
  0x26   : > { %483 = vst [vmem:[%s2088_s30 + $0xf0] sm:$0xff] %v482_v30  ;;  %485 = vst [vmem:[%s2088_s30 + $0xf8] sm:$0xff] %v484_v31  ;;  %v488_v33 = vld [vmem:[%s2083_s29 + $0x208] sm:$0xff]  ;;  %v490_v34 = vld [vmem:[%s2083_s29 + $0x210] sm:$0xff] }
  0x27   : > { %487 = vst [vmem:[%s2088_s30 + $0x100] sm:$0xff] %v486_v32  ;;  %v492_v35 = vld [vmem:[%s2083_s29 + $0x218] sm:$0xff]  ;;  %489 = vst [vmem:[%s2088_s30 + $0x108] sm:$0xff] %v488_v33  ;;  %v494_v36 = vld [vmem:[%s2083_s29 + $0x220] sm:$0xff] }
  0x28   : > { %491 = vst [vmem:[%s2088_s30 + $0x110] sm:$0xff] %v490_v34  ;;  %493 = vst [vmem:[%s2088_s30 + $0x118] sm:$0xff] %v492_v35  ;;  %v496_v37 = vld [vmem:[%s2083_s29 + $0x228] sm:$0xff]  ;;  %v498_v38 = vld [vmem:[%s2083_s29 + $0x230] sm:$0xff] }
  0x29   : > { %495 = vst [vmem:[%s2088_s30 + $0x120] sm:$0xff] %v494_v36  ;;  %497 = vst [vmem:[%s2088_s30 + $0x128] sm:$0xff] %v496_v37  ;;  %v500_v39 = vld [vmem:[%s2083_s29 + $0x238] sm:$0xff]  ;;  %v502_v40 = vld [vmem:[%s2083_s29 + $0x240] sm:$0xff] }
  0x2a   : > { %499 = vst [vmem:[%s2088_s30 + $0x130] sm:$0xff] %v498_v38  ;;  %v504_v41 = vld [vmem:[%s2083_s29 + $0x248] sm:$0xff]  ;;  %501 = vst [vmem:[%s2088_s30 + $0x138] sm:$0xff] %v500_v39  ;;  %v506_v42 = vld [vmem:[%s2083_s29 + $0x250] sm:$0xff] }
  0x2b   : > { %503 = vst [vmem:[%s2088_s30 + $0x140] sm:$0xff] %v502_v40  ;;  %505 = vst [vmem:[%s2088_s30 + $0x148] sm:$0xff] %v504_v41  ;;  %v508_v43 = vld [vmem:[%s2083_s29 + $0x258] sm:$0xff]  ;;  %v510_v44 = vld [vmem:[%s2083_s29 + $0x260] sm:$0xff] }
  0x2c   : > { %507 = vst [vmem:[%s2088_s30 + $0x150] sm:$0xff] %v506_v42  ;;  %509 = vst [vmem:[%s2088_s30 + $0x158] sm:$0xff] %v508_v43  ;;  %v512_v45 = vld [vmem:[%s2083_s29 + $0x268] sm:$0xff]  ;;  %v514_v46 = vld [vmem:[%s2083_s29 + $0x270] sm:$0xff] }
  0x2d   : > { %511 = vst [vmem:[%s2088_s30 + $0x160] sm:$0xff] %v510_v44  ;;  %v516_v47 = vld [vmem:[%s2083_s29 + $0x278] sm:$0xff]  ;;  %513 = vst [vmem:[%s2088_s30 + $0x168] sm:$0xff] %v512_v45  ;;  %v518_v48 = vld [vmem:[%s2083_s29 + $0x280] sm:$0xff] }
  0x2e   : > { %515 = vst [vmem:[%s2088_s30 + $0x170] sm:$0xff] %v514_v46  ;;  %517 = vst [vmem:[%s2088_s30 + $0x178] sm:$0xff] %v516_v47  ;;  %v520_v49 = vld [vmem:[%s2083_s29 + $0x288] sm:$0xff]  ;;  %v522_v50 = vld [vmem:[%s2083_s29 + $0x290] sm:$0xff] }
  0x2f   : > { %519 = vst [vmem:[%s2088_s30 + $0x180] sm:$0xff] %v518_v48  ;;  %521 = vst [vmem:[%s2088_s30 + $0x188] sm:$0xff] %v520_v49  ;;  %v524_v51 = vld [vmem:[%s2083_s29 + $0x298] sm:$0xff]  ;;  %v526_v52 = vld [vmem:[%s2083_s29 + $0x2a0] sm:$0xff] }
  0x30   : > { %523 = vst [vmem:[%s2088_s30 + $0x190] sm:$0xff] %v522_v50  ;;  %v528_v53 = vld [vmem:[%s2083_s29 + $0x2a8] sm:$0xff]  ;;  %525 = vst [vmem:[%s2088_s30 + $0x198] sm:$0xff] %v524_v51  ;;  %v530_v54 = vld [vmem:[%s2083_s29 + $0x2b0] sm:$0xff] }
  0x31   : > { %527 = vst [vmem:[%s2088_s30 + $0x1a0] sm:$0xff] %v526_v52  ;;  %529 = vst [vmem:[%s2088_s30 + $0x1a8] sm:$0xff] %v528_v53  ;;  %v532_v55 = vld [vmem:[%s2083_s29 + $0x2b8] sm:$0xff]  ;;  %v534_v56 = vld [vmem:[%s2083_s29 + $0x2c0] sm:$0xff] }
  0x32   : > { %531 = vst [vmem:[%s2088_s30 + $0x1b0] sm:$0xff] %v530_v54  ;;  %533 = vst [vmem:[%s2088_s30 + $0x1b8] sm:$0xff] %v532_v55  ;;  %v536_v57 = vld [vmem:[%s2083_s29 + $0x2c8] sm:$0xff]  ;;  %v538_v58 = vld [vmem:[%s2083_s29 + $0x2d0] sm:$0xff] }
  0x33   : > { %535 = vst [vmem:[%s2088_s30 + $0x1c0] sm:$0xff] %v534_v56  ;;  %v540_v59 = vld [vmem:[%s2083_s29 + $0x2d8] sm:$0xff]  ;;  %537 = vst [vmem:[%s2088_s30 + $0x1c8] sm:$0xff] %v536_v57  ;;  %v542_v60 = vld [vmem:[%s2083_s29 + $0x2e0] sm:$0xff] }
  0x34   : > { %539 = vst [vmem:[%s2088_s30 + $0x1d0] sm:$0xff] %v538_v58  ;;  %541 = vst [vmem:[%s2088_s30 + $0x1d8] sm:$0xff] %v540_v59  ;;  %v544_v61 = vld [vmem:[%s2083_s29 + $0x2e8] sm:$0xff]  ;;  %v546_v62 = vld [vmem:[%s2083_s29 + $0x2f0] sm:$0xff] }
  0x35   : > { %543 = vst [vmem:[%s2088_s30 + $0x1e0] sm:$0xff] %v542_v60  ;;  %545 = vst [vmem:[%s2088_s30 + $0x1e8] sm:$0xff] %v544_v61  ;;  %v548_v63 = vld [vmem:[%s2083_s29 + $0x2f8] sm:$0xff]  ;;  %v550_v0 = vld [vmem:[%s2083_s29 + $0x400] sm:$0xff] }
  0x36   : > { %547 = vst [vmem:[%s2088_s30 + $0x1f0] sm:$0xff] %v546_v62  ;;  %v552_v1 = vld [vmem:[%s2083_s29 + $0x408] sm:$0xff]  ;;  %549 = vst [vmem:[%s2088_s30 + $0x1f8] sm:$0xff] %v548_v63  ;;  %v554_v2 = vld [vmem:[%s2083_s29 + $0x410] sm:$0xff] }
  0x37   : > { %551 = vst [vmem:[%s2088_s30 + $0x200] sm:$0xff] %v550_v0  ;;  %553 = vst [vmem:[%s2088_s30 + $0x208] sm:$0xff] %v552_v1  ;;  %v556_v3 = vld [vmem:[%s2083_s29 + $0x418] sm:$0xff]  ;;  %v558_v4 = vld [vmem:[%s2083_s29 + $0x420] sm:$0xff] }
  0x38   : > { %555 = vst [vmem:[%s2088_s30 + $0x210] sm:$0xff] %v554_v2  ;;  %557 = vst [vmem:[%s2088_s30 + $0x218] sm:$0xff] %v556_v3  ;;  %v560_v5 = vld [vmem:[%s2083_s29 + $0x428] sm:$0xff]  ;;  %v562_v6 = vld [vmem:[%s2083_s29 + $0x430] sm:$0xff] }
  0x39   : > { %559 = vst [vmem:[%s2088_s30 + $0x220] sm:$0xff] %v558_v4  ;;  %v564_v7 = vld [vmem:[%s2083_s29 + $0x438] sm:$0xff]  ;;  %561 = vst [vmem:[%s2088_s30 + $0x228] sm:$0xff] %v560_v5  ;;  %v566_v8 = vld [vmem:[%s2083_s29 + $0x440] sm:$0xff] }
  0x3a   : > { %563 = vst [vmem:[%s2088_s30 + $0x230] sm:$0xff] %v562_v6  ;;  %565 = vst [vmem:[%s2088_s30 + $0x238] sm:$0xff] %v564_v7  ;;  %v568_v9 = vld [vmem:[%s2083_s29 + $0x448] sm:$0xff]  ;;  %v570_v10 = vld [vmem:[%s2083_s29 + $0x450] sm:$0xff] }
  0x3b   : > { %567 = vst [vmem:[%s2088_s30 + $0x240] sm:$0xff] %v566_v8  ;;  %569 = vst [vmem:[%s2088_s30 + $0x248] sm:$0xff] %v568_v9  ;;  %v572_v11 = vld [vmem:[%s2083_s29 + $0x458] sm:$0xff]  ;;  %v574_v12 = vld [vmem:[%s2083_s29 + $0x460] sm:$0xff] }
  0x3c   : > { %571 = vst [vmem:[%s2088_s30 + $0x250] sm:$0xff] %v570_v10  ;;  %v576_v13 = vld [vmem:[%s2083_s29 + $0x468] sm:$0xff]  ;;  %573 = vst [vmem:[%s2088_s30 + $0x258] sm:$0xff] %v572_v11  ;;  %v578_v14 = vld [vmem:[%s2083_s29 + $0x470] sm:$0xff] }
  0x3d   : > { %575 = vst [vmem:[%s2088_s30 + $0x260] sm:$0xff] %v574_v12  ;;  %577 = vst [vmem:[%s2088_s30 + $0x268] sm:$0xff] %v576_v13  ;;  %v580_v15 = vld [vmem:[%s2083_s29 + $0x478] sm:$0xff]  ;;  %v582_v16 = vld [vmem:[%s2083_s29 + $0x480] sm:$0xff] }
  0x3e   : > { %579 = vst [vmem:[%s2088_s30 + $0x270] sm:$0xff] %v578_v14  ;;  %581 = vst [vmem:[%s2088_s30 + $0x278] sm:$0xff] %v580_v15  ;;  %v584_v17 = vld [vmem:[%s2083_s29 + $0x488] sm:$0xff]  ;;  %v586_v18 = vld [vmem:[%s2083_s29 + $0x490] sm:$0xff] }
  0x3f   : > { %583 = vst [vmem:[%s2088_s30 + $0x280] sm:$0xff] %v582_v16  ;;  %v588_v19 = vld [vmem:[%s2083_s29 + $0x498] sm:$0xff]  ;;  %585 = vst [vmem:[%s2088_s30 + $0x288] sm:$0xff] %v584_v17  ;;  %v590_v20 = vld [vmem:[%s2083_s29 + $0x4a0] sm:$0xff] }
  0x40   : > { %587 = vst [vmem:[%s2088_s30 + $0x290] sm:$0xff] %v586_v18  ;;  %589 = vst [vmem:[%s2088_s30 + $0x298] sm:$0xff] %v588_v19  ;;  %v592_v21 = vld [vmem:[%s2083_s29 + $0x4a8] sm:$0xff]  ;;  %v594_v22 = vld [vmem:[%s2083_s29 + $0x4b0] sm:$0xff] }
  0x41   : > { %591 = vst [vmem:[%s2088_s30 + $0x2a0] sm:$0xff] %v590_v20  ;;  %593 = vst [vmem:[%s2088_s30 + $0x2a8] sm:$0xff] %v592_v21  ;;  %v596_v23 = vld [vmem:[%s2083_s29 + $0x4b8] sm:$0xff]  ;;  %v598_v24 = vld [vmem:[%s2083_s29 + $0x4c0] sm:$0xff] }
  0x42   : > { %595 = vst [vmem:[%s2088_s30 + $0x2b0] sm:$0xff] %v594_v22  ;;  %v600_v25 = vld [vmem:[%s2083_s29 + $0x4c8] sm:$0xff]  ;;  %597 = vst [vmem:[%s2088_s30 + $0x2b8] sm:$0xff] %v596_v23  ;;  %v602_v26 = vld [vmem:[%s2083_s29 + $0x4d0] sm:$0xff] }
  0x43   : > { %599 = vst [vmem:[%s2088_s30 + $0x2c0] sm:$0xff] %v598_v24  ;;  %601 = vst [vmem:[%s2088_s30 + $0x2c8] sm:$0xff] %v600_v25  ;;  %v604_v27 = vld [vmem:[%s2083_s29 + $0x4d8] sm:$0xff]  ;;  %v606_v28 = vld [vmem:[%s2083_s29 + $0x4e0] sm:$0xff] }
  0x44   : > { %603 = vst [vmem:[%s2088_s30 + $0x2d0] sm:$0xff] %v602_v26  ;;  %605 = vst [vmem:[%s2088_s30 + $0x2d8] sm:$0xff] %v604_v27  ;;  %v608_v29 = vld [vmem:[%s2083_s29 + $0x4e8] sm:$0xff]  ;;  %v610_v30 = vld [vmem:[%s2083_s29 + $0x4f0] sm:$0xff] }
  0x45   : > { %607 = vst [vmem:[%s2088_s30 + $0x2e0] sm:$0xff] %v606_v28  ;;  %v612_v31 = vld [vmem:[%s2083_s29 + $0x4f8] sm:$0xff]  ;;  %609 = vst [vmem:[%s2088_s30 + $0x2e8] sm:$0xff] %v608_v29  ;;  %v614_v32 = vld [vmem:[%s2083_s29 + $0x600] sm:$0xff] }
  0x46   : > { %611 = vst [vmem:[%s2088_s30 + $0x2f0] sm:$0xff] %v610_v30  ;;  %613 = vst [vmem:[%s2088_s30 + $0x2f8] sm:$0xff] %v612_v31  ;;  %v616_v33 = vld [vmem:[%s2083_s29 + $0x608] sm:$0xff]  ;;  %v618_v34 = vld [vmem:[%s2083_s29 + $0x610] sm:$0xff] }
  0x47   : > { %615 = vst [vmem:[%s2088_s30 + $0x300] sm:$0xff] %v614_v32  ;;  %617 = vst [vmem:[%s2088_s30 + $0x308] sm:$0xff] %v616_v33  ;;  %v620_v35 = vld [vmem:[%s2083_s29 + $0x618] sm:$0xff]  ;;  %v622_v36 = vld [vmem:[%s2083_s29 + $0x620] sm:$0xff] }
  0x48   : > { %619 = vst [vmem:[%s2088_s30 + $0x310] sm:$0xff] %v618_v34  ;;  %v624_v37 = vld [vmem:[%s2083_s29 + $0x628] sm:$0xff]  ;;  %621 = vst [vmem:[%s2088_s30 + $0x318] sm:$0xff] %v620_v35  ;;  %v626_v38 = vld [vmem:[%s2083_s29 + $0x630] sm:$0xff] }
  0x49   : > { %623 = vst [vmem:[%s2088_s30 + $0x320] sm:$0xff] %v622_v36  ;;  %625 = vst [vmem:[%s2088_s30 + $0x328] sm:$0xff] %v624_v37  ;;  %v628_v39 = vld [vmem:[%s2083_s29 + $0x638] sm:$0xff]  ;;  %v630_v40 = vld [vmem:[%s2083_s29 + $0x640] sm:$0xff] }
  0x4a   : > { %627 = vst [vmem:[%s2088_s30 + $0x330] sm:$0xff] %v626_v38  ;;  %629 = vst [vmem:[%s2088_s30 + $0x338] sm:$0xff] %v628_v39  ;;  %v632_v41 = vld [vmem:[%s2083_s29 + $0x648] sm:$0xff]  ;;  %v634_v42 = vld [vmem:[%s2083_s29 + $0x650] sm:$0xff] }
  0x4b   : > { %631 = vst [vmem:[%s2088_s30 + $0x340] sm:$0xff] %v630_v40  ;;  %v636_v43 = vld [vmem:[%s2083_s29 + $0x658] sm:$0xff]  ;;  %633 = vst [vmem:[%s2088_s30 + $0x348] sm:$0xff] %v632_v41  ;;  %v638_v44 = vld [vmem:[%s2083_s29 + $0x660] sm:$0xff] }
  0x4c   : > { %635 = vst [vmem:[%s2088_s30 + $0x350] sm:$0xff] %v634_v42  ;;  %637 = vst [vmem:[%s2088_s30 + $0x358] sm:$0xff] %v636_v43  ;;  %v640_v45 = vld [vmem:[%s2083_s29 + $0x668] sm:$0xff]  ;;  %v642_v46 = vld [vmem:[%s2083_s29 + $0x670] sm:$0xff] }
  0x4d   : > { %639 = vst [vmem:[%s2088_s30 + $0x360] sm:$0xff] %v638_v44  ;;  %641 = vst [vmem:[%s2088_s30 + $0x368] sm:$0xff] %v640_v45  ;;  %v644_v47 = vld [vmem:[%s2083_s29 + $0x678] sm:$0xff]  ;;  %v646_v48 = vld [vmem:[%s2083_s29 + $0x680] sm:$0xff] }
  0x4e   : > { %643 = vst [vmem:[%s2088_s30 + $0x370] sm:$0xff] %v642_v46  ;;  %v648_v49 = vld [vmem:[%s2083_s29 + $0x688] sm:$0xff]  ;;  %645 = vst [vmem:[%s2088_s30 + $0x378] sm:$0xff] %v644_v47  ;;  %v650_v50 = vld [vmem:[%s2083_s29 + $0x690] sm:$0xff] }
  0x4f   : > { %647 = vst [vmem:[%s2088_s30 + $0x380] sm:$0xff] %v646_v48  ;;  %649 = vst [vmem:[%s2088_s30 + $0x388] sm:$0xff] %v648_v49  ;;  %v652_v51 = vld [vmem:[%s2083_s29 + $0x698] sm:$0xff]  ;;  %v654_v52 = vld [vmem:[%s2083_s29 + $0x6a0] sm:$0xff] }
  0x50   : > { %651 = vst [vmem:[%s2088_s30 + $0x390] sm:$0xff] %v650_v50  ;;  %653 = vst [vmem:[%s2088_s30 + $0x398] sm:$0xff] %v652_v51  ;;  %v656_v53 = vld [vmem:[%s2083_s29 + $0x6a8] sm:$0xff]  ;;  %v658_v54 = vld [vmem:[%s2083_s29 + $0x6b0] sm:$0xff] }
  0x51   : > { %655 = vst [vmem:[%s2088_s30 + $0x3a0] sm:$0xff] %v654_v52  ;;  %v660_v55 = vld [vmem:[%s2083_s29 + $0x6b8] sm:$0xff]  ;;  %657 = vst [vmem:[%s2088_s30 + $0x3a8] sm:$0xff] %v656_v53  ;;  %v662_v56 = vld [vmem:[%s2083_s29 + $0x6c0] sm:$0xff] }
  0x52   : > { %659 = vst [vmem:[%s2088_s30 + $0x3b0] sm:$0xff] %v658_v54  ;;  %661 = vst [vmem:[%s2088_s30 + $0x3b8] sm:$0xff] %v660_v55  ;;  %v664_v57 = vld [vmem:[%s2083_s29 + $0x6c8] sm:$0xff]  ;;  %v666_v58 = vld [vmem:[%s2083_s29 + $0x6d0] sm:$0xff] }
  0x53   : > { %663 = vst [vmem:[%s2088_s30 + $0x3c0] sm:$0xff] %v662_v56  ;;  %665 = vst [vmem:[%s2088_s30 + $0x3c8] sm:$0xff] %v664_v57  ;;  %v668_v59 = vld [vmem:[%s2083_s29 + $0x6d8] sm:$0xff]  ;;  %v670_v60 = vld [vmem:[%s2083_s29 + $0x6e0] sm:$0xff] }
  0x54   : > { %667 = vst [vmem:[%s2088_s30 + $0x3d0] sm:$0xff] %v666_v58  ;;  %v672_v61 = vld [vmem:[%s2083_s29 + $0x6e8] sm:$0xff]  ;;  %669 = vst [vmem:[%s2088_s30 + $0x3d8] sm:$0xff] %v668_v59  ;;  %v674_v62 = vld [vmem:[%s2083_s29 + $0x6f0] sm:$0xff] }
  0x55   : > { %671 = vst [vmem:[%s2088_s30 + $0x3e0] sm:$0xff] %v670_v60  ;;  %673 = vst [vmem:[%s2088_s30 + $0x3e8] sm:$0xff] %v672_v61  ;;  %v676_v63 = vld [vmem:[%s2083_s29 + $0x6f8] sm:$0xff] }
  0x56   : > { %675 = vst [vmem:[%s2088_s30 + $0x3f0] sm:$0xff] %v674_v62  ;;  %677 = vst [vmem:[%s2088_s30 + $0x3f8] sm:$0xff] %v676_v63 }
  0x57 PF: > { %p1706_p10 = scmp.ge.s32.totalorder %s2004_s15, 1  ;;  %p682_p11 = scmp.lt.s32.totalorder %s2004_s15, 3 }
  0x59   : > { %p683_p12 = pnand %p1706_p10, %p682_p11 }
  0x5a   : > { %v1937_v0 = vld [vmem:[%s2869_s2] sm:$0xff] (!%p683_p12)   ;;  %s2349_s6 = sand.u32 (!%p683_p12), 1, %s1996_s13   ;;  %v1938_v1 = vld [vmem:[%s2869_s2 + $0x8] sm:$0xff] (!%p683_p12)   ;;  %v1939_v2 = vld [vmem:[%s2869_s2 + $0x10] sm:$0xff] (!%p683_p12)   ;;  %vm1376_vm0 = vcmask (!%p683_p12), 392192   ;;  %s1832_s5 = sshll.u32 (!%p683_p12), %s1699_s16, 12 }
  0x5b   : > { %686 = sbr.rel (%p683_p12) target bundleno = 457 (0x1c9), region = 66  ;;  %s1707_s9 = sshll.u32 (!%p683_p12), %s2349_s6, 10  ;;  %1852 = vmatprep.subr.bf16.mxu0 (!%p683_p12), %v1937_v0  ;;  %1890 = vmatprep.subr.bf16.mxu1 (!%p683_p12), %v1937_v0  ;;  %v2361_v3 = vld [vmem:[%s2868_s1] ss:$0 sm:$0xff] (!%p683_p12)  ;;  %v2366_v4 = vld [vmem:[%s2868_s1 + $0x1] ss:$0 sm:$0xff] (!%p683_p12) }
  0x5c   : > { %1853 = vmatpush3.bf16.msra.mxu0 (!%p683_p12), %v1937_v0  ;;  %1893 = vmatpush3.bf16.msra.mxu1 (!%p683_p12), %v1937_v0  ;;  %s2368_s25 = scalar_lea.vmem (!%p683_p12), [#allocation2], %s1707_s9  ;;  %s1708_s30 = sshll.u32 (!%p683_p12), %s2349_s6, 8 }
  0x5d   : > { %v717_v5 = vld [vmem:[%s2368_s25] sm:$0xff] (!%p683_p12)  ;;  %1854 = vmatprep.subr.bf16.mxu0 (!%p683_p12), %v1938_v1  ;;  %1891 = vmatprep.subr.bf16.mxu1 (!%p683_p12), %v1938_v1  ;;  %v718_v6 = vld [vmem:[%s2368_s25 + $0x8] sm:$0xff] (!%p683_p12)  ;;  %v719_v60 = vld [vmem:[%s2368_s25 + $0x10] sm:$0xff] (!%p683_p12)  ;;  %s2781_s4 = scalar_lea.vmem (!%p683_p12), [#allocation3], %s1708_s30  ;;  %s2818_s10 = scalar_lea.hbm (!%p683_p12), %s2870_s3, %s1832_s5 }
  0x5e   : > { %v753_v7 = vmul.f32 (!%p683_p12), %v2361_v3, %v717_v5  ;;  %v1711_v8 = vld [vmem:[%s2368_s25 + $0x100] sm:$0xff] (!%p683_p12)  ;;  %v1712_v9 = vld [vmem:[%s2368_s25 + $0x108] sm:$0xff] (!%p683_p12)  ;;  %v754_v10 = vmul.f32 (!%p683_p12), %v2361_v3, %v718_v6  ;;  %s1632_s7 = sshll.u32 (!%p683_p12), %s2781_s4, 4  ;;  %s1619_s16 = scalar_lea.sflag (!%p683_p12), [#allocation4], %s2349_s6  ;;  %s2820_s7 = int_to_ptr.vmem [resolvable:$true] %s1632_s7 }
  0x5f   : > { %v886_v11 = vmul.f32 (!%p683_p12), %v1711_v8, %v2361_v3  ;;  %v887_v12 = vmul.f32 (!%p683_p12), %v1712_v9, %v2361_v3  ;;  %v1743_v13 = vld [vmem:[%s2368_s25 + $0x200] sm:$0xff] (!%p683_p12)  ;;  %v1744_v14 = vld [vmem:[%s2368_s25 + $0x208] sm:$0xff] (!%p683_p12)  ;;  %v1713_v8 = vld [vmem:[%s2368_s25 + $0x110] sm:$0xff] (!%p683_p12)  ;;  %s1942_s11 = scalar_lea.vmem (!%p683_p12), %s2820_s7, 4096  ;;  %s2006_s17 = smov (!%p683_p12), [#allocation3]  }
  0x60   : > { %v1775_v15 = vld [vmem:[%s2368_s25 + $0x300] sm:$0xff] (!%p683_p12)  ;;  %v789_v16 = vadd.f32 (!%p683_p12), %v2366_v4, %v753_v7  ;;  %v1047_v17 = vmul.f32 (!%p683_p12), %v1743_v13, %v2361_v3  ;;  %v1048_v18 = vmul.f32 (!%p683_p12), %v1744_v14, %v2361_v3  ;;  %v1776_v19 = vld [vmem:[%s2368_s25 + $0x308] sm:$0xff] (!%p683_p12)  ;;  %1855 = vmatpush3.bf16.msra.mxu0 (!%p683_p12), %v1938_v1  ;;  %1894 = vmatpush3.bf16.msra.mxu1 (!%p683_p12), %v1938_v1  ;;  %v720_v7 = vld [vmem:[%s2368_s25 + $0x18] sm:$0xff] (!%p683_p12)  ;;  %p1943_p13 = scmp.ne.s32.totalorder (!%p683_p12), %s2820_s7, %s1942_s11  ;;  %s1946_s19 = sshll.u32 (!%p683_p12), %s2006_s17, 4  ;;  %s1947_s19 = int_to_ptr.vmem [resolvable:$false] %s1946_s19 }
  0x61   : > { %v1176_v20 = vmul.f32 (!%p683_p12), %v1775_v15, %v2361_v3  ;;  %v790_v21 = vadd.f32 (!%p683_p12), %v2366_v4, %v754_v10  ;;  %v918_v22 = vadd.f32 (!%p683_p12), %v2366_v4, %v886_v11  ;;  %v919_v23 = vadd.f32 (!%p683_p12), %v2366_v4, %v887_v12  ;;  %v733_v24 = vld [vmem:[%s2368_s25 + $0x80] sm:$0xff] (!%p683_p12)  ;;  %1856 = vmatprep.subr.bf16.mxu0 (!%p683_p12), %v1939_v2  ;;  %v734_v29 = vld [vmem:[%s2368_s25 + $0x88] sm:$0xff] (!%p683_p12)  ;;  %v1714_v13 = vld [vmem:[%s2368_s25 + $0x118] sm:$0xff] (!%p683_p12)  ;;  %s1948_s20 = scalar_lea.vmem (!%p683_p12), %s1947_s19, 8192  ;;  %p1949_p2 = scmp.lt.s32.totalorder (!%p683_p12), %s2820_s7, %s1947_s19 }
  0x62   : > { %1892 = vmatprep.subr.bf16.mxu1 %v1939_v2  ;;  %v821_v25 = vmax.f32 %v789_v16, 0.0  ;;  %v1079_v26 = vadd.f32 %v2366_v4, %v1047_v17  ;;  %v1080_v27 = vadd.f32 %v2366_v4, %v1048_v18  ;;  %v1177_v28 = vmul.f32 %v1776_v19, %v2361_v3  ;;  %v1727_v34 = vld [vmem:[%s2368_s25 + $0x180] sm:$0xff]  ;;  %v1728_v35 = vld [vmem:[%s2368_s25 + $0x188] sm:$0xff]  ;;  %v1745_v14 = vld [vmem:[%s2368_s25 + $0x210] sm:$0xff]  ;;  %p1944_p0 = pnand %p1943_p13, %p2067_p6  ;;  %p1950_p3 = scmp.lt.s32.totalorder %s1948_s20, %s1942_s11 }
  0x63   : > { %v822_v30 = vmax.f32 %v790_v21, 0.0  ;;  %v950_v31 = vmax.f32 %v918_v22, 0.0  ;;  %v951_v32 = vmax.f32 %v919_v23, 0.0  ;;  %v1208_v33 = vadd.f32 %v2366_v4, %v1176_v20  ;;  %v1759_v40 = vld [vmem:[%s2368_s25 + $0x280] sm:$0xff]  ;;  %v1760_v41 = vld [vmem:[%s2368_s25 + $0x288] sm:$0xff]  ;;  %v1746_v15 = vld [vmem:[%s2368_s25 + $0x218] sm:$0xff] }
  0x64   : > { %v1111_v36 = vmax.f32 %v1079_v26, 0.0  ;;  %v1112_v37 = vmax.f32 %v1080_v27, 0.0  ;;  %v1209_v38 = vadd.f32 %v2366_v4, %v1177_v28  ;;  %v769_v39 = vmul.f32 %v2361_v3, %v733_v24  ;;  %1857 = vmatpush3.bf16.msra.mxu0 %v1939_v2  ;;  %1895 = vmatpush3.bf16.msra.mxu1 %v1939_v2  ;;  %v1791_v54 = vld [vmem:[%s2368_s25 + $0x380] sm:$0xff]  ;;  %v1792_v59 = vld [vmem:[%s2368_s25 + $0x388] sm:$0xff]  ;;  %v1777_v28 = vld [vmem:[%s2368_s25 + $0x310] sm:$0xff]  ;;  %p1945_p1 = pneg %p1944_p0  ;;  %p1951_p4 = por %p1950_p3, %p1949_p2 }
  0x65   : > { %v982_v42 = vadd.f32 %v950_v31, %v821_v25  ;;  %v983_v43 = vadd.f32 %v951_v32, %v822_v30  ;;  %v1240_v44 = vmax.f32 %v1208_v33, 0.0  ;;  %v770_v45 = vmul.f32 %v2361_v3, %v734_v29 }
  0x66   : > { %v1241_v46 = vmax.f32 %v1209_v38, 0.0  ;;  %v805_v47 = vadd.f32 %v2366_v4, %v769_v39  ;;  %v902_v48 = vmul.f32 %v1727_v34, %v2361_v3  ;;  %v903_v49 = vmul.f32 %v1728_v35, %v2361_v3  ;;  %p1952_p5 = pnand %p1951_p4, %p1945_p1 }
  0x67   : > { %v1272_v50 = vadd.f32 %v1240_v44, %v1111_v36  ;;  %v806_v51 = vadd.f32 %v2366_v4, %v770_v45  ;;  %v1063_v52 = vmul.f32 %v1759_v40, %v2361_v3  ;;  %v1064_v53 = vmul.f32 %v1760_v41, %v2361_v3  ;;  %v1729_v44 = vld [vmem:[%s2368_s25 + $0x190] sm:$0xff] }
  0x68   : > { %v1273_v55 = vadd.f32 %v1241_v46, %v1112_v37  ;;  %v837_v56 = vmax.f32 %v805_v47, 0.0  ;;  %v934_v57 = vadd.f32 %v2366_v4, %v902_v48  ;;  %v935_v58 = vadd.f32 %v2366_v4, %v903_v49  ;;  %v1778_v37 = vld [vmem:[%s2368_s25 + $0x318] sm:$0xff] }
  0x69   : > { %v1304_v61 = vadd.f32 %v1272_v50, %v982_v42  ;;  %v838_v62 = vmax.f32 %v806_v51, 0.0  ;;  %v1095_v63 = vadd.f32 %v2366_v4, %v1063_v52  ;;  %v1096_v0 = vadd.f32 %v2366_v4, %v1064_v53  ;;  %v735_v42 = vld [vmem:[%s2368_s25 + $0x90] sm:$0xff]  ;;  %v1730_v49 = vld [vmem:[%s2368_s25 + $0x198] sm:$0xff] }
  0x6a   : > { %v1305_v1 = vadd.f32 %v1273_v55, %v983_v43  ;;  %v966_v2 = vmax.f32 %v934_v57, 0.0  ;;  %v967_v5 = vmax.f32 %v935_v58, 0.0  ;;  %v1192_v6 = vmul.f32 %v1791_v54, %v2361_v3  ;;  %v736_v43 = vld [vmem:[%s2368_s25 + $0x98] sm:$0xff]  ;;  %v1761_v54 = vld [vmem:[%s2368_s25 + $0x290] sm:$0xff] }
  0x6b   : > { %v1127_v9 = vmax.f32 %v1095_v63, 0.0  ;;  %v1128_v10 = vmax.f32 %v1096_v0, 0.0  ;;  %v1193_v11 = vmul.f32 %v1792_v59, %v2361_v3  ;;  %v755_v12 = vmul.f32 %v2361_v3, %v719_v60  ;;  %v1762_v59 = vld [vmem:[%s2368_s25 + $0x298] sm:$0xff] }
  0x6c   : > { %v1336_v16 = vpack.c.bf16 %v1305_v1, %v1304_v61  ;;  %v998_v17 = vadd.f32 %v966_v2, %v837_v56  ;;  %v999_v18 = vadd.f32 %v967_v5, %v838_v62  ;;  %v1224_v19 = vadd.f32 %v2366_v4, %v1192_v6 }
  0x6d   : > { %v1225_v20 = vadd.f32 %v2366_v4, %v1193_v11  ;;  %v756_v21 = vmul.f32 %v2361_v3, %v720_v7  ;;  %v791_v22 = vadd.f32 %v2366_v4, %v755_v12  ;;  %v888_v23 = vmul.f32 %v1713_v8, %v2361_v3  ;;  %v1794_v11 = vld [vmem:[%s2368_s25 + $0x398] sm:$0xff] }
  0x6e   : > { %1858 = vmatprep.mubr.msk.bf16.mxu0 %vm1376_vm0, %v1336_v16  ;;  %v1256_v24 = vmax.f32 %v1224_v19, 0.0  ;;  %v889_v25 = vmul.f32 %v1714_v13, %v2361_v3  ;;  %v1049_v26 = vmul.f32 %v1745_v14, %v2361_v3  ;;  %v1050_v27 = vmul.f32 %v1746_v15, %v2361_v3  ;;  %v721_v16 = vld [vmem:[%s2368_s25 + $0x20] sm:$0xff] }
  0x6f   : > { %v1257_v29 = vmax.f32 %v1225_v20, 0.0  ;;  %v792_v30 = vadd.f32 %v2366_v4, %v756_v21  ;;  %v823_v31 = vmax.f32 %v791_v22, 0.0  ;;  %v920_v32 = vadd.f32 %v2366_v4, %v888_v23  ;;  %v722_v21 = vld [vmem:[%s2368_s25 + $0x28] sm:$0xff]  ;;  %v1715_v22 = vld [vmem:[%s2368_s25 + $0x120] sm:$0xff] }
  0x70   : > { %v1288_v33 = vadd.f32 %v1256_v24, %v1127_v9  ;;  %v921_v34 = vadd.f32 %v2366_v4, %v889_v25  ;;  %v1081_v35 = vadd.f32 %v2366_v4, %v1049_v26  ;;  %v1082_v36 = vadd.f32 %v2366_v4, %v1050_v27  ;;  %v1716_v27 = vld [vmem:[%s2368_s25 + $0x128] sm:$0xff] }
  0x71   : > { %v1289_v38 = vadd.f32 %v1257_v29, %v1128_v10  ;;  %v824_v39 = vmax.f32 %v792_v30, 0.0  ;;  %v952_v40 = vmax.f32 %v920_v32, 0.0  ;;  %v1178_v41 = vmul.f32 %v1777_v28, %v2361_v3  ;;  %v1793_v10 = vld [vmem:[%s2368_s25 + $0x390] sm:$0xff]  ;;  %v1747_v28 = vld [vmem:[%s2368_s25 + $0x220] sm:$0xff] }
  0x72   : > { %v1320_v45 = vadd.f32 %v1288_v33, %v998_v17  ;;  %v953_v46 = vmax.f32 %v921_v34, 0.0  ;;  %v1113_v47 = vmax.f32 %v1081_v35, 0.0  ;;  %v1114_v48 = vmax.f32 %v1082_v36, 0.0 }
  0x73   : > { %v1321_v50 = vadd.f32 %v1289_v38, %v999_v18  ;;  %v984_v51 = vadd.f32 %v952_v40, %v823_v31  ;;  %v1179_v52 = vmul.f32 %v1778_v37, %v2361_v3  ;;  %v1210_v53 = vadd.f32 %v2366_v4, %v1178_v41  ;;  %v1748_v37 = vld [vmem:[%s2368_s25 + $0x228] sm:$0xff] }
  0x74   : > { %v985_v55 = vadd.f32 %v953_v46, %v824_v39  ;;  %v771_v56 = vmul.f32 %v2361_v3, %v735_v42  ;;  %v772_v57 = vmul.f32 %v2361_v3, %v736_v43  ;;  %v904_v58 = vmul.f32 %v1729_v44, %v2361_v3  ;;  %v1779_v46 = vld [vmem:[%s2368_s25 + $0x320] sm:$0xff] }
  0x75   : > { %v1344_v60 = vpack.c.bf16 %v1321_v50, %v1320_v45  ;;  %v1211_v61 = vadd.f32 %v2366_v4, %v1179_v52  ;;  %v1242_v62 = vmax.f32 %v1210_v53, 0.0  ;;  %v905_v63 = vmul.f32 %v1730_v49, %v2361_v3 }
  0x76   : > { %v807_v0 = vadd.f32 %v2366_v4, %v771_v56  ;;  %v808_v1 = vadd.f32 %v2366_v4, %v772_v57  ;;  %v936_v2 = vadd.f32 %v2366_v4, %v904_v58  ;;  %v1065_v5 = vmul.f32 %v1761_v54, %v2361_v3  ;;  %v737_v56 = vld [vmem:[%s2368_s25 + $0xa0] sm:$0xff] }
  0x77   : > { %1874 = vmatprep.mubr.msk.bf16.mxu1 %vm1376_vm0, %v1344_v60  ;;  %v1243_v6 = vmax.f32 %v1211_v61, 0.0  ;;  %v1274_v7 = vadd.f32 %v1242_v62, %v1113_v47  ;;  %v937_v8 = vadd.f32 %v2366_v4, %v905_v63  ;;  %v1066_v9 = vmul.f32 %v1762_v59, %v2361_v3  ;;  %v738_v61 = vld [vmem:[%s2368_s25 + $0xa8] sm:$0xff]  ;;  %v1731_v62 = vld [vmem:[%s2368_s25 + $0x1a0] sm:$0xff] }
  0x78   : > { %v839_v12 = vmax.f32 %v807_v0, 0.0  ;;  %v840_v13 = vmax.f32 %v808_v1, 0.0  ;;  %v968_v14 = vmax.f32 %v936_v2, 0.0  ;;  %v1097_v15 = vadd.f32 %v2366_v4, %v1065_v5  ;;  %v1732_v5 = vld [vmem:[%s2368_s25 + $0x1a8] sm:$0xff] }
  0x79   : > { %v1275_v17 = vadd.f32 %v1243_v6, %v1114_v48  ;;  %v1306_v18 = vadd.f32 %v1274_v7, %v984_v51  ;;  %v969_v19 = vmax.f32 %v937_v8, 0.0  ;;  %v1098_v20 = vadd.f32 %v2366_v4, %v1066_v9  ;;  %v1780_v51 = vld [vmem:[%s2368_s25 + $0x328] sm:$0xff]  ;;  %v1763_v6 = vld [vmem:[%s2368_s25 + $0x2a0] sm:$0xff] }
  0x7a   : > { %v1000_v23 = vadd.f32 %v968_v14, %v839_v12  ;;  %v1129_v24 = vmax.f32 %v1097_v15, 0.0  ;;  %v1194_v25 = vmul.f32 %v1793_v10, %v2361_v3  ;;  %v1195_v26 = vmul.f32 %v1794_v11, %v2361_v3  ;;  %v1764_v11 = vld [vmem:[%s2368_s25 + $0x2a8] sm:$0xff] }
  0x7b   : > { %v1307_v29 = vadd.f32 %v1275_v17, %v985_v55  ;;  %v1001_v30 = vadd.f32 %v969_v19, %v840_v13  ;;  %v1130_v31 = vmax.f32 %v1098_v20, 0.0  ;;  %v757_v32 = vmul.f32 %v2361_v3, %v721_v16 }
  0x7c   : > { %v1226_v33 = vadd.f32 %v2366_v4, %v1194_v25  ;;  %v1227_v34 = vadd.f32 %v2366_v4, %v1195_v26  ;;  %v758_v35 = vmul.f32 %v2361_v3, %v722_v21  ;;  %v890_v36 = vmul.f32 %v1715_v22, %v2361_v3 }
  0x7d   : > { %v1337_v38 = vpack.c.bf16 %v1307_v29, %v1306_v18  ;;  %v793_v39 = vadd.f32 %v2366_v4, %v757_v32  ;;  %v891_v40 = vmul.f32 %v1716_v27, %v2361_v3  ;;  %v1051_v41 = vmul.f32 %v1747_v28, %v2361_v3  ;;  %v1796_v29 = vld [vmem:[%s2368_s25 + $0x3a8] sm:$0xff] }
  0x7e   : > { %v1258_v42 = vmax.f32 %v1226_v33, 0.0  ;;  %v1259_v43 = vmax.f32 %v1227_v34, 0.0  ;;  %v794_v44 = vadd.f32 %v2366_v4, %v758_v35  ;;  %v922_v45 = vadd.f32 %v2366_v4, %v890_v36  ;;  %v723_v34 = vld [vmem:[%s2368_s25 + $0x30] sm:$0xff]  ;;  %v724_v35 = vld [vmem:[%s2368_s25 + $0x38] sm:$0xff] }
  0x7f   : > { %1859 = vmatmul.mubr.msk.bf16.vlgmr.msra.gmra.mrb[0].mxu0 %vm1376_vm0, %v1337_v38  ;;  %v825_v47 = vmax.f32 %v793_v39, 0.0  ;;  %v923_v48 = vadd.f32 %v2366_v4, %v891_v40  ;;  %v1052_v49 = vmul.f32 %v1748_v37, %v2361_v3  ;;  %v1083_v50 = vadd.f32 %v2366_v4, %v1051_v41  ;;  %v1717_v40 = vld [vmem:[%s2368_s25 + $0x130] sm:$0xff]  ;;  %v1718_v41 = vld [vmem:[%s2368_s25 + $0x138] sm:$0xff] }
  0x80   : > { %v1290_v52 = vadd.f32 %v1258_v42, %v1129_v24  ;;  %v1291_v53 = vadd.f32 %v1259_v43, %v1130_v31  ;;  %v826_v54 = vmax.f32 %v794_v44, 0.0  ;;  %v954_v55 = vmax.f32 %v922_v45, 0.0  ;;  %v1795_v24 = vld [vmem:[%s2368_s25 + $0x3a0] sm:$0xff] }
  0x81   : > { %v955_v57 = vmax.f32 %v923_v48, 0.0  ;;  %v1084_v58 = vadd.f32 %v2366_v4, %v1052_v49  ;;  %v1115_v59 = vmax.f32 %v1083_v50, 0.0  ;;  %v1180_v60 = vmul.f32 %v1779_v46, %v2361_v3  ;;  %v1749_v46 = vld [vmem:[%s2368_s25 + $0x230] sm:$0xff] }
  0x82   : > { %v1322_v63 = vadd.f32 %v1290_v52, %v1000_v23  ;;  %v1323_v0 = vadd.f32 %v1291_v53, %v1001_v30  ;;  %v986_v1 = vadd.f32 %v954_v55, %v825_v47  ;;  %v1181_v2 = vmul.f32 %v1780_v51, %v2361_v3  ;;  %v1750_v51 = vld [vmem:[%s2368_s25 + $0x238] sm:$0xff] }
  0x83   : > { %v987_v7 = vadd.f32 %v955_v57, %v826_v54  ;;  %v1116_v8 = vmax.f32 %v1084_v58, 0.0  ;;  %v1212_v9 = vadd.f32 %v2366_v4, %v1180_v60  ;;  %v773_v10 = vmul.f32 %v2361_v3, %v737_v56 }
  0x84   : > { %v1345_v12 = vpack.c.bf16 %v1323_v0, %v1322_v63  ;;  %v1213_v13 = vadd.f32 %v2366_v4, %v1181_v2  ;;  %v774_v14 = vmul.f32 %v2361_v3, %v738_v61  ;;  %v906_v15 = vmul.f32 %v1731_v62, %v2361_v3  ;;  %v1781_v0 = vld [vmem:[%s2368_s25 + $0x330] sm:$0xff] }
  0x85   : > { %v1244_v16 = vmax.f32 %v1212_v9, 0.0  ;;  %v809_v17 = vadd.f32 %v2366_v4, %v773_v10  ;;  %v907_v18 = vmul.f32 %v1732_v5, %v2361_v3  ;;  %v1067_v19 = vmul.f32 %v1763_v6, %v2361_v3 }
  0x86   : > { %1875 = vmatmul.mubr.msk.bf16.vlgmr.msra.gmra.mrb[0].mxu1 %vm1376_vm0, %v1345_v12  ;;  %v1245_v20 = vmax.f32 %v1213_v13, 0.0  ;;  %v810_v21 = vadd.f32 %v2366_v4, %v774_v14  ;;  %v938_v22 = vadd.f32 %v2366_v4, %v906_v15  ;;  %v1068_v23 = vmul.f32 %v1764_v11, %v2361_v3  ;;  %v739_v12 = vld [vmem:[%s2368_s25 + $0xb0] sm:$0xff]  ;;  %v740_v13 = vld [vmem:[%s2368_s25 + $0xb8] sm:$0xff] }
  0x87   : > { %v1276_v25 = vadd.f32 %v1244_v16, %v1115_v59  ;;  %v841_v26 = vmax.f32 %v809_v17, 0.0  ;;  %v939_v27 = vadd.f32 %v2366_v4, %v907_v18  ;;  %v1099_v28 = vadd.f32 %v2366_v4, %v1067_v19  ;;  %v1733_v18 = vld [vmem:[%s2368_s25 + $0x1b0] sm:$0xff]  ;;  %v1734_v19 = vld [vmem:[%s2368_s25 + $0x1b8] sm:$0xff] }
  0x88   : > { %v1277_v30 = vadd.f32 %v1245_v20, %v1116_v8  ;;  %v842_v31 = vmax.f32 %v810_v21, 0.0  ;;  %v970_v32 = vmax.f32 %v938_v22, 0.0  ;;  %v1100_v33 = vadd.f32 %v2366_v4, %v1068_v23  ;;  %v1765_v20 = vld [vmem:[%s2368_s25 + $0x2b0] sm:$0xff] }
  0x89   : > { %v1308_v36 = vadd.f32 %v1276_v25, %v986_v1  ;;  %v971_v37 = vmax.f32 %v939_v27, 0.0  ;;  %v1131_v38 = vmax.f32 %v1099_v28, 0.0  ;;  %v1196_v39 = vmul.f32 %v1795_v24, %v2361_v3  ;;  %v1782_v1 = vld [vmem:[%s2368_s25 + $0x338] sm:$0xff] }
  0x8a   : > { %v1309_v42 = vadd.f32 %v1277_v30, %v987_v7  ;;  %v1002_v43 = vadd.f32 %v970_v32, %v841_v26  ;;  %v1132_v44 = vmax.f32 %v1100_v33, 0.0  ;;  %v1197_v45 = vmul.f32 %v1796_v29, %v2361_v3  ;;  %v1766_v29 = vld [vmem:[%s2368_s25 + $0x2b8] sm:$0xff] }
  0x8b   : > { %v1003_v47 = vadd.f32 %v971_v37, %v842_v31  ;;  %v1228_v48 = vadd.f32 %v2366_v4, %v1196_v39  ;;  %v759_v49 = vmul.f32 %v2361_v3, %v723_v34  ;;  %v760_v50 = vmul.f32 %v2361_v3, %v724_v35 }
  0x8c   : > { %v1338_v52 = vpack.c.bf16 %v1309_v42, %v1308_v36  ;;  %v1229_v53 = vadd.f32 %v2366_v4, %v1197_v45  ;;  %v892_v54 = vmul.f32 %v1717_v40, %v2361_v3  ;;  %v893_v55 = vmul.f32 %v1718_v41, %v2361_v3  ;;  %v1797_v42 = vld [vmem:[%s2368_s25 + $0x3b0] sm:$0xff] }
  0x8d   : > { %v1260_v56 = vmax.f32 %v1228_v48, 0.0  ;;  %v795_v57 = vadd.f32 %v2366_v4, %v759_v49  ;;  %v796_v58 = vadd.f32 %v2366_v4, %v760_v50  ;;  %v1053_v59 = vmul.f32 %v1749_v46, %v2361_v3  ;;  %v725_v48 = vld [vmem:[%s2368_s25 + $0x40] sm:$0xff] }
  0x8e   : > { %1862 = vmatprep.mubr.msk.bf16.mxu0 %vm1376_vm0, %v1338_v52  ;;  %v1261_v60 = vmax.f32 %v1229_v53, 0.0  ;;  %v924_v61 = vadd.f32 %v2366_v4, %v892_v54  ;;  %v925_v62 = vadd.f32 %v2366_v4, %v893_v55  ;;  %v1054_v63 = vmul.f32 %v1750_v51, %v2361_v3  ;;  %v726_v53 = vld [vmem:[%s2368_s25 + $0x48] sm:$0xff] }
  0x8f   : > { %v1292_v2 = vadd.f32 %v1260_v56, %v1131_v38  ;;  %v827_v5 = vmax.f32 %v795_v57, 0.0  ;;  %v828_v6 = vmax.f32 %v796_v58, 0.0  ;;  %v1085_v7 = vadd.f32 %v2366_v4, %v1053_v59  ;;  %v1719_v58 = vld [vmem:[%s2368_s25 + $0x140] sm:$0xff]  ;;  %v1720_v59 = vld [vmem:[%s2368_s25 + $0x148] sm:$0xff] }
  0x90   : > { %v1293_v8 = vadd.f32 %v1261_v60, %v1132_v44  ;;  %v956_v9 = vmax.f32 %v924_v61, 0.0  ;;  %v957_v10 = vmax.f32 %v925_v62, 0.0  ;;  %v1086_v11 = vadd.f32 %v2366_v4, %v1054_v63  ;;  %v1751_v60 = vld [vmem:[%s2368_s25 + $0x240] sm:$0xff] }
  0x91   : > { %v1324_v14 = vadd.f32 %v1292_v2, %v1002_v43  ;;  %v1117_v15 = vmax.f32 %v1085_v7, 0.0  ;;  %v1182_v16 = vmul.f32 %v1781_v0, %v2361_v3  ;;  %v1183_v17 = vmul.f32 %v1782_v1, %v2361_v3  ;;  %v1798_v43 = vld [vmem:[%s2368_s25 + $0x3b8] sm:$0xff]  ;;  %v1752_v1 = vld [vmem:[%s2368_s25 + $0x248] sm:$0xff] }
  0x92   : > { %v1325_v21 = vadd.f32 %v1293_v8, %v1003_v47  ;;  %v988_v22 = vadd.f32 %v956_v9, %v827_v5  ;;  %v989_v23 = vadd.f32 %v957_v10, %v828_v6  ;;  %v1118_v24 = vmax.f32 %v1086_v11, 0.0 }
  0x93   : > { %v1214_v25 = vadd.f32 %v2366_v4, %v1182_v16  ;;  %v1215_v26 = vadd.f32 %v2366_v4, %v1183_v17  ;;  %v775_v27 = vmul.f32 %v2361_v3, %v739_v12  ;;  %v776_v28 = vmul.f32 %v2361_v3, %v740_v13  ;;  %v1783_v16 = vld [vmem:[%s2368_s25 + $0x340] sm:$0xff] }
  0x94   : > { %v1346_v30 = vpack.c.bf16 %v1325_v21, %v1324_v14  ;;  %v908_v31 = vmul.f32 %v1733_v18, %v2361_v3  ;;  %v909_v32 = vmul.f32 %v1734_v19, %v2361_v3  ;;  %v1069_v33 = vmul.f32 %v1765_v20, %v2361_v3  ;;  %v1784_v21 = vld [vmem:[%s2368_s25 + $0x348] sm:$0xff] }
  0x95   : > { %v1246_v34 = vmax.f32 %v1214_v25, 0.0  ;;  %v1247_v35 = vmax.f32 %v1215_v26, 0.0  ;;  %v811_v36 = vadd.f32 %v2366_v4, %v775_v27  ;;  %v812_v37 = vadd.f32 %v2366_v4, %v776_v28  ;;  %v741_v26 = vld [vmem:[%s2368_s25 + $0xc0] sm:$0xff] }
  0x96   : > { %1878 = vmatprep.mubr.msk.bf16.mxu1 %vm1376_vm0, %v1346_v30  ;;  %v940_v38 = vadd.f32 %v2366_v4, %v908_v31  ;;  %v941_v39 = vadd.f32 %v2366_v4, %v909_v32  ;;  %v1070_v40 = vmul.f32 %v1766_v29, %v2361_v3  ;;  %v1101_v41 = vadd.f32 %v2366_v4, %v1069_v33  ;;  %v742_v31 = vld [vmem:[%s2368_s25 + $0xc8] sm:$0xff]  ;;  %v1735_v32 = vld [vmem:[%s2368_s25 + $0x1c0] sm:$0xff] }
  0x97   : > { %v1278_v44 = vadd.f32 %v1246_v34, %v1117_v15  ;;  %v1279_v45 = vadd.f32 %v1247_v35, %v1118_v24  ;;  %v843_v46 = vmax.f32 %v811_v36, 0.0  ;;  %v844_v47 = vmax.f32 %v812_v37, 0.0  ;;  %v1736_v37 = vld [vmem:[%s2368_s25 + $0x1c8] sm:$0xff] }
  0x98   : > { %v972_v49 = vmax.f32 %v940_v38, 0.0  ;;  %v973_v50 = vmax.f32 %v941_v39, 0.0  ;;  %v1102_v51 = vadd.f32 %v2366_v4, %v1070_v40  ;;  %v1133_v52 = vmax.f32 %v1101_v41, 0.0  ;;  %v1767_v38 = vld [vmem:[%s2368_s25 + $0x2c0] sm:$0xff] }
  0x99   : > { %v1310_v54 = vadd.f32 %v1278_v44, %v988_v22  ;;  %v1311_v55 = vadd.f32 %v1279_v45, %v989_v23  ;;  %v1198_v56 = vmul.f32 %v1797_v42, %v2361_v3  ;;  %v1199_v57 = vmul.f32 %v1798_v43, %v2361_v3  ;;  %v1768_v43 = vld [vmem:[%s2368_s25 + $0x2c8] sm:$0xff] }
  0x9a   : > { %v1004_v61 = vadd.f32 %v972_v49, %v843_v46  ;;  %v1005_v62 = vadd.f32 %v973_v50, %v844_v47  ;;  %v1134_v63 = vmax.f32 %v1102_v51, 0.0  ;;  %v761_v0 = vmul.f32 %v2361_v3, %v725_v48 }
  0x9b   : > { %v1339_v2 = vpack.c.bf16 %v1311_v55, %v1310_v54  ;;  %v1230_v5 = vadd.f32 %v2366_v4, %v1198_v56  ;;  %v1231_v6 = vadd.f32 %v2366_v4, %v1199_v57  ;;  %v762_v7 = vmul.f32 %v2361_v3, %v726_v53  ;;  %v1799_v56 = vld [vmem:[%s2368_s25 + $0x3c0] sm:$0xff] }
  0x9c   : > { %v797_v8 = vadd.f32 %v2366_v4, %v761_v0  ;;  %v894_v9 = vmul.f32 %v1719_v58, %v2361_v3  ;;  %v895_v10 = vmul.f32 %v1720_v59, %v2361_v3  ;;  %v1055_v11 = vmul.f32 %v1751_v60, %v2361_v3 }
  0x9d   : > { %1863 = vmatmul.mubr.msk.bf16.gmra.mrb[4].mxu0 %vm1376_vm0, %v1339_v2  ;;  %v1262_v12 = vmax.f32 %v1230_v5, 0.0  ;;  %v1263_v13 = vmax.f32 %v1231_v6, 0.0  ;;  %v798_v14 = vadd.f32 %v2366_v4, %v762_v7  ;;  %v1056_v15 = vmul.f32 %v1752_v1, %v2361_v3  ;;  %v727_v2 = vld [vmem:[%s2368_s25 + $0x50] sm:$0xff]  ;;  %v728_v5 = vld [vmem:[%s2368_s25 + $0x58] sm:$0xff] }
  0x9e   : > { %v829_v17 = vmax.f32 %v797_v8, 0.0  ;;  %v926_v18 = vadd.f32 %v2366_v4, %v894_v9  ;;  %v927_v19 = vadd.f32 %v2366_v4, %v895_v10  ;;  %v1087_v20 = vadd.f32 %v2366_v4, %v1055_v11  ;;  %v1721_v10 = vld [vmem:[%s2368_s25 + $0x150] sm:$0xff]  ;;  %v1722_v11 = vld [vmem:[%s2368_s25 + $0x158] sm:$0xff] }
  0x9f   : > { %v1294_v22 = vadd.f32 %v1262_v12, %v1133_v52  ;;  %v1295_v23 = vadd.f32 %v1263_v13, %v1134_v63  ;;  %v830_v24 = vmax.f32 %v798_v14, 0.0  ;;  %v1088_v25 = vadd.f32 %v2366_v4, %v1056_v15 }
  0xa0   : > { %v958_v27 = vmax.f32 %v926_v18, 0.0  ;;  %v959_v28 = vmax.f32 %v927_v19, 0.0  ;;  %v1119_v29 = vmax.f32 %v1087_v20, 0.0  ;;  %v1184_v30 = vmul.f32 %v1783_v16, %v2361_v3  ;;  %v1753_v16 = vld [vmem:[%s2368_s25 + $0x250] sm:$0xff] }
  0xa1   : > { %v1326_v33 = vadd.f32 %v1294_v22, %v1004_v61  ;;  %v1327_v34 = vadd.f32 %v1295_v23, %v1005_v62  ;;  %v1120_v35 = vmax.f32 %v1088_v25, 0.0  ;;  %v1185_v36 = vmul.f32 %v1784_v21, %v2361_v3  ;;  %v1800_v61 = vld [vmem:[%s2368_s25 + $0x3c8] sm:$0xff]  ;;  %v1754_v21 = vld [vmem:[%s2368_s25 + $0x258] sm:$0xff] }
  0xa2   : > { %v990_v39 = vadd.f32 %v958_v27, %v829_v17  ;;  %v991_v40 = vadd.f32 %v959_v28, %v830_v24  ;;  %v1216_v41 = vadd.f32 %v2366_v4, %v1184_v30  ;;  %v777_v42 = vmul.f32 %v2361_v3, %v741_v26 }
  0xa3   : > { %v1347_v44 = vpack.c.bf16 %v1327_v34, %v1326_v33  ;;  %v1217_v45 = vadd.f32 %v2366_v4, %v1185_v36  ;;  %v778_v46 = vmul.f32 %v2361_v3, %v742_v31  ;;  %v910_v47 = vmul.f32 %v1735_v32, %v2361_v3  ;;  %v1785_v34 = vld [vmem:[%s2368_s25 + $0x350] sm:$0xff] }
  0xa4   : > { %v1248_v48 = vmax.f32 %v1216_v41, 0.0  ;;  %v813_v49 = vadd.f32 %v2366_v4, %v777_v42  ;;  %v911_v50 = vmul.f32 %v1736_v37, %v2361_v3  ;;  %v1071_v51 = vmul.f32 %v1767_v38, %v2361_v3 }
  0xa5   : > { %1879 = vmatmul.mubr.msk.bf16.gmra.mrb[4].mxu1 %vm1376_vm0, %v1347_v44  ;;  %v1249_v52 = vmax.f32 %v1217_v45, 0.0  ;;  %v814_v53 = vadd.f32 %v2366_v4, %v778_v46  ;;  %v942_v54 = vadd.f32 %v2366_v4, %v910_v47  ;;  %v1072_v55 = vmul.f32 %v1768_v43, %v2361_v3  ;;  %v743_v44 = vld [vmem:[%s2368_s25 + $0xd0] sm:$0xff]  ;;  %v744_v45 = vld [vmem:[%s2368_s25 + $0xd8] sm:$0xff] }
  0xa6   : > { %v1280_v57 = vadd.f32 %v1248_v48, %v1119_v29  ;;  %v845_v58 = vmax.f32 %v813_v49, 0.0  ;;  %v943_v59 = vadd.f32 %v2366_v4, %v911_v50  ;;  %v1103_v60 = vadd.f32 %v2366_v4, %v1071_v51  ;;  %v1737_v50 = vld [vmem:[%s2368_s25 + $0x1d0] sm:$0xff]  ;;  %v1738_v51 = vld [vmem:[%s2368_s25 + $0x1d8] sm:$0xff] }
  0xa7   : > { %v1281_v62 = vadd.f32 %v1249_v52, %v1120_v35  ;;  %v846_v63 = vmax.f32 %v814_v53, 0.0  ;;  %v974_v0 = vmax.f32 %v942_v54, 0.0  ;;  %v1104_v1 = vadd.f32 %v2366_v4, %v1072_v55  ;;  %v1786_v35 = vld [vmem:[%s2368_s25 + $0x358] sm:$0xff]  ;;  %v1769_v52 = vld [vmem:[%s2368_s25 + $0x2d0] sm:$0xff] }
  0xa8   : > { %v1312_v6 = vadd.f32 %v1280_v57, %v990_v39  ;;  %v975_v7 = vmax.f32 %v943_v59, 0.0  ;;  %v1135_v8 = vmax.f32 %v1103_v60, 0.0  ;;  %v1200_v9 = vmul.f32 %v1799_v56, %v2361_v3 }
  0xa9   : > { %v1313_v12 = vadd.f32 %v1281_v62, %v991_v40  ;;  %v1006_v13 = vadd.f32 %v974_v0, %v845_v58  ;;  %v1136_v14 = vmax.f32 %v1104_v1, 0.0  ;;  %v1201_v15 = vmul.f32 %v1800_v61, %v2361_v3  ;;  %v1770_v61 = vld [vmem:[%s2368_s25 + $0x2d8] sm:$0xff] }
  0xaa   : > { %v1007_v17 = vadd.f32 %v975_v7, %v846_v63  ;;  %v1232_v18 = vadd.f32 %v2366_v4, %v1200_v9  ;;  %v763_v19 = vmul.f32 %v2361_v3, %v727_v2  ;;  %v764_v20 = vmul.f32 %v2361_v3, %v728_v5 }
  0xab   : > { %v1340_v22 = vpack.c.bf16 %v1313_v12, %v1312_v6  ;;  %v1233_v23 = vadd.f32 %v2366_v4, %v1201_v15  ;;  %v896_v24 = vmul.f32 %v1721_v10, %v2361_v3  ;;  %v897_v25 = vmul.f32 %v1722_v11, %v2361_v3  ;;  %v1801_v12 = vld [vmem:[%s2368_s25 + $0x3d0] sm:$0xff] }
  0xac   : > { %v1264_v26 = vmax.f32 %v1232_v18, 0.0  ;;  %v799_v27 = vadd.f32 %v2366_v4, %v763_v19  ;;  %v800_v28 = vadd.f32 %v2366_v4, %v764_v20  ;;  %v1057_v29 = vmul.f32 %v1753_v16, %v2361_v3  ;;  %v729_v18 = vld [vmem:[%s2368_s25 + $0x60] sm:$0xff] }
  0xad   : > { %1866 = vmatprep.mubr.msk.bf16.mxu0 %vm1376_vm0, %v1340_v22  ;;  %v1265_v30 = vmax.f32 %v1233_v23, 0.0  ;;  %v928_v31 = vadd.f32 %v2366_v4, %v896_v24  ;;  %v929_v32 = vadd.f32 %v2366_v4, %v897_v25  ;;  %v1058_v33 = vmul.f32 %v1754_v21, %v2361_v3  ;;  %v730_v23 = vld [vmem:[%s2368_s25 + $0x68] sm:$0xff] }
  0xae   : > { %v1296_v36 = vadd.f32 %v1264_v26, %v1135_v8  ;;  %v831_v37 = vmax.f32 %v799_v27, 0.0  ;;  %v832_v38 = vmax.f32 %v800_v28, 0.0  ;;  %v1089_v39 = vadd.f32 %v2366_v4, %v1057_v29  ;;  %v1723_v28 = vld [vmem:[%s2368_s25 + $0x160] sm:$0xff]  ;;  %v1724_v29 = vld [vmem:[%s2368_s25 + $0x168] sm:$0xff] }
  0xaf   : > { %v1297_v40 = vadd.f32 %v1265_v30, %v1136_v14  ;;  %v960_v41 = vmax.f32 %v928_v31, 0.0  ;;  %v961_v42 = vmax.f32 %v929_v32, 0.0  ;;  %v1090_v43 = vadd.f32 %v2366_v4, %v1058_v33  ;;  %v1755_v30 = vld [vmem:[%s2368_s25 + $0x260] sm:$0xff] }
  0xb0   : > { %v1328_v46 = vadd.f32 %v1296_v36, %v1006_v13  ;;  %v1121_v47 = vmax.f32 %v1089_v39, 0.0  ;;  %v1186_v48 = vmul.f32 %v1785_v34, %v2361_v3  ;;  %v1187_v49 = vmul.f32 %v1786_v35, %v2361_v3  ;;  %v1802_v13 = vld [vmem:[%s2368_s25 + $0x3d8] sm:$0xff]  ;;  %v1756_v35 = vld [vmem:[%s2368_s25 + $0x268] sm:$0xff] }
  0xb1   : > { %v1329_v53 = vadd.f32 %v1297_v40, %v1007_v17  ;;  %v992_v54 = vadd.f32 %v960_v41, %v831_v37  ;;  %v993_v55 = vadd.f32 %v961_v42, %v832_v38  ;;  %v1122_v56 = vmax.f32 %v1090_v43, 0.0 }
  0xb2   : > { %v1218_v57 = vadd.f32 %v2366_v4, %v1186_v48  ;;  %v1219_v58 = vadd.f32 %v2366_v4, %v1187_v49  ;;  %v779_v59 = vmul.f32 %v2361_v3, %v743_v44  ;;  %v780_v60 = vmul.f32 %v2361_v3, %v744_v45  ;;  %v1787_v48 = vld [vmem:[%s2368_s25 + $0x360] sm:$0xff] }
  0xb3   : > { %v1348_v62 = vpack.c.bf16 %v1329_v53, %v1328_v46  ;;  %v912_v63 = vmul.f32 %v1737_v50, %v2361_v3  ;;  %v913_v0 = vmul.f32 %v1738_v51, %v2361_v3  ;;  %v1073_v1 = vmul.f32 %v1769_v52, %v2361_v3  ;;  %v1788_v53 = vld [vmem:[%s2368_s25 + $0x368] sm:$0xff] }
  0xb4   : > { %v1250_v2 = vmax.f32 %v1218_v57, 0.0  ;;  %v1251_v5 = vmax.f32 %v1219_v58, 0.0  ;;  %v815_v6 = vadd.f32 %v2366_v4, %v779_v59  ;;  %v816_v7 = vadd.f32 %v2366_v4, %v780_v60  ;;  %v745_v58 = vld [vmem:[%s2368_s25 + $0xe0] sm:$0xff] }
  0xb5   : > { %1882 = vmatprep.mubr.msk.bf16.mxu1 %vm1376_vm0, %v1348_v62  ;;  %v944_v8 = vadd.f32 %v2366_v4, %v912_v63  ;;  %v945_v9 = vadd.f32 %v2366_v4, %v913_v0  ;;  %v1074_v10 = vmul.f32 %v1770_v61, %v2361_v3  ;;  %v1105_v11 = vadd.f32 %v2366_v4, %v1073_v1  ;;  %v2693_v61 = vld [vmem:[%s2868_s1] ss:$0 sm:$0xff]  ;;  %v746_v63 = vld [vmem:[%s2368_s25 + $0xe8] sm:$0xff] }
  0xb6   : > { %v1282_v14 = vadd.f32 %v1250_v2, %v1121_v47  ;;  %v1283_v15 = vadd.f32 %v1251_v5, %v1122_v56  ;;  %v847_v16 = vmax.f32 %v815_v6, 0.0  ;;  %v848_v17 = vmax.f32 %v816_v7, 0.0  ;;  %v1739_v0 = vld [vmem:[%s2368_s25 + $0x1e0] sm:$0xff] }
  0xb7   : > { %v976_v19 = vmax.f32 %v944_v8, 0.0  ;;  %v977_v20 = vmax.f32 %v945_v9, 0.0  ;;  %v1106_v21 = vadd.f32 %v2366_v4, %v1074_v10  ;;  %v1137_v22 = vmax.f32 %v1105_v11, 0.0  ;;  %v1771_v7 = vld [vmem:[%s2368_s25 + $0x2e0] sm:$0xff] }
  0xb8   : > { %v1314_v24 = vadd.f32 %v1282_v14, %v992_v54  ;;  %v1315_v25 = vadd.f32 %v1283_v15, %v993_v55  ;;  %v1202_v26 = vmul.f32 %v1801_v12, %v2361_v3  ;;  %v1203_v27 = vmul.f32 %v1802_v13, %v2361_v3  ;;  %v2704_v10 = vld [vmem:[%s2868_s1 + $0x1] ss:$0 sm:$0xff]  ;;  %v1772_v13 = vld [vmem:[%s2368_s25 + $0x2e8] sm:$0xff] }
  0xb9   : > { %v1008_v31 = vadd.f32 %v976_v19, %v847_v16  ;;  %v1009_v32 = vadd.f32 %v977_v20, %v848_v17  ;;  %v1138_v33 = vmax.f32 %v1106_v21, 0.0  ;;  %v765_v34 = vmul.f32 %v2361_v3, %v729_v18 }
  0xba   : > { %v1341_v36 = vpack.c.bf16 %v1315_v25, %v1314_v24  ;;  %v1234_v37 = vadd.f32 %v2366_v4, %v1202_v26  ;;  %v1235_v38 = vadd.f32 %v2366_v4, %v1203_v27  ;;  %v766_v39 = vmul.f32 %v2361_v3, %v730_v23  ;;  %v1803_v26 = vld [vmem:[%s2368_s25 + $0x3e0] sm:$0xff] }
  0xbb   : > { %v801_v40 = vadd.f32 %v2366_v4, %v765_v34  ;;  %v898_v41 = vmul.f32 %v1723_v28, %v2361_v3  ;;  %v899_v42 = vmul.f32 %v1724_v29, %v2361_v3  ;;  %v1059_v43 = vmul.f32 %v1755_v30, %v2361_v3 }
  0xbc   : > { %1867 = vmatmul.mubr.msk.bf16.gmra.mrb[8].mxu0 %vm1376_vm0, %v1341_v36  ;;  %v1266_v44 = vmax.f32 %v1234_v37, 0.0  ;;  %v1267_v45 = vmax.f32 %v1235_v38, 0.0  ;;  %v802_v46 = vadd.f32 %v2366_v4, %v766_v39  ;;  %v1060_v47 = vmul.f32 %v1756_v35, %v2361_v3  ;;  %v731_v36 = vld [vmem:[%s2368_s25 + $0x70] sm:$0xff]  ;;  %v732_v37 = vld [vmem:[%s2368_s25 + $0x78] sm:$0xff] }
  0xbd   : > { %v833_v49 = vmax.f32 %v801_v40, 0.0  ;;  %v930_v50 = vadd.f32 %v2366_v4, %v898_v41  ;;  %v931_v51 = vadd.f32 %v2366_v4, %v899_v42  ;;  %v1091_v52 = vadd.f32 %v2366_v4, %v1059_v43  ;;  %v1725_v42 = vld [vmem:[%s2368_s25 + $0x170] sm:$0xff]  ;;  %v1726_v43 = vld [vmem:[%s2368_s25 + $0x178] sm:$0xff] }
  0xbe   : > { %v1298_v54 = vadd.f32 %v1266_v44, %v1137_v22  ;;  %v1299_v55 = vadd.f32 %v1267_v45, %v1138_v33  ;;  %v834_v56 = vmax.f32 %v802_v46, 0.0  ;;  %v1092_v57 = vadd.f32 %v2366_v4, %v1060_v47  ;;  %v1740_v4 = vld [vmem:[%s2368_s25 + $0x1e8] sm:$0xff] }
  0xbf   : > { %v962_v3 = vmax.f32 %v930_v50, 0.0  ;;  %v963_v59 = vmax.f32 %v931_v51, 0.0  ;;  %v1123_v60 = vmax.f32 %v1091_v52, 0.0  ;;  %v1188_v62 = vmul.f32 %v2693_v61, %v1787_v48  ;;  %v1757_v48 = vld [vmem:[%s2368_s25 + $0x270] sm:$0xff] }
  0xc0   : > { %v1330_v1 = vadd.f32 %v1298_v54, %v1008_v31  ;;  %v1331_v2 = vadd.f32 %v1299_v55, %v1009_v32  ;;  %v1124_v5 = vmax.f32 %v1092_v57, 0.0  ;;  %v1189_v6 = vmul.f32 %v2693_v61, %v1788_v53  ;;  %v1804_v31 = vld [vmem:[%s2368_s25 + $0x3e8] sm:$0xff]  ;;  %v1758_v53 = vld [vmem:[%s2368_s25 + $0x278] sm:$0xff] }
  0xc1   : > { %v994_v8 = vadd.f32 %v962_v3, %v833_v49  ;;  %v995_v9 = vadd.f32 %v963_v59, %v834_v56  ;;  %v1220_v11 = vadd.f32 %v2704_v10, %v1188_v62  ;;  %v781_v12 = vmul.f32 %v2693_v61, %v745_v58 }
  0xc2   : > { %v1349_v14 = vpack.c.bf16 %v1331_v2, %v1330_v1  ;;  %v1221_v15 = vadd.f32 %v2704_v10, %v1189_v6  ;;  %v782_v16 = vmul.f32 %v2693_v61, %v746_v63  ;;  %v914_v17 = vmul.f32 %v2693_v61, %v1739_v0  ;;  %v1789_v2 = vld [vmem:[%s2368_s25 + $0x370] sm:$0xff] }
  0xc3   : > { %v1252_v18 = vmax.f32 %v1220_v11, 0.0  ;;  %v817_v19 = vadd.f32 %v2704_v10, %v781_v12  ;;  %v915_v20 = vmul.f32 %v2693_v61, %v1740_v4  ;;  %v1075_v21 = vmul.f32 %v2693_v61, %v1771_v7 }
  0xc4   : > { %1883 = vmatmul.mubr.msk.bf16.gmra.mrb[8].mxu1 %vm1376_vm0, %v1349_v14  ;;  %v1253_v22 = vmax.f32 %v1221_v15, 0.0  ;;  %v818_v23 = vadd.f32 %v2704_v10, %v782_v16  ;;  %v946_v24 = vadd.f32 %v2704_v10, %v914_v17  ;;  %v1076_v25 = vmul.f32 %v2693_v61, %v1772_v13  ;;  %v747_v14 = vld [vmem:[%s2368_s25 + $0xf0] sm:$0xff]  ;;  %v748_v15 = vld [vmem:[%s2368_s25 + $0xf8] sm:$0xff] }
  0xc5   : > { %v1284_v27 = vadd.f32 %v1252_v18, %v1123_v60  ;;  %v849_v28 = vmax.f32 %v817_v19, 0.0  ;;  %v947_v29 = vadd.f32 %v2704_v10, %v915_v20  ;;  %v1107_v30 = vadd.f32 %v2704_v10, %v1075_v21  ;;  %v1741_v20 = vld [vmem:[%s2368_s25 + $0x1f0] sm:$0xff]  ;;  %v1742_v21 = vld [vmem:[%s2368_s25 + $0x1f8] sm:$0xff] }
  0xc6   : > { %v1285_v32 = vadd.f32 %v1253_v22, %v1124_v5  ;;  %v850_v33 = vmax.f32 %v818_v23, 0.0  ;;  %v978_v34 = vmax.f32 %v946_v24, 0.0  ;;  %v1108_v35 = vadd.f32 %v2704_v10, %v1076_v25  ;;  %v1790_v5 = vld [vmem:[%s2368_s25 + $0x378] sm:$0xff]  ;;  %v1773_v22 = vld [vmem:[%s2368_s25 + $0x2f0] sm:$0xff] }
  0xc7   : > { %v1316_v38 = vadd.f32 %v1284_v27, %v994_v8  ;;  %v979_v39 = vmax.f32 %v947_v29, 0.0  ;;  %v1139_v40 = vmax.f32 %v1107_v30, 0.0  ;;  %v1204_v41 = vmul.f32 %v2693_v61, %v1803_v26 }
  0xc8   : > { %v1317_v44 = vadd.f32 %v1285_v32, %v995_v9  ;;  %v1010_v45 = vadd.f32 %v978_v34, %v849_v28  ;;  %v1140_v46 = vmax.f32 %v1108_v35, 0.0  ;;  %v1205_v47 = vmul.f32 %v2693_v61, %v1804_v31  ;;  %v1774_v31 = vld [vmem:[%s2368_s25 + $0x2f8] sm:$0xff] }
  0xc9   : > { %v1011_v49 = vadd.f32 %v979_v39, %v850_v33  ;;  %v1236_v50 = vadd.f32 %v2704_v10, %v1204_v41  ;;  %v767_v51 = vmul.f32 %v2693_v61, %v731_v36  ;;  %v768_v52 = vmul.f32 %v2693_v61, %v732_v37 }
  0xca   : > { %v1342_v54 = vpack.c.bf16 %v1317_v44, %v1316_v38  ;;  %v1237_v55 = vadd.f32 %v2704_v10, %v1205_v47  ;;  %v900_v56 = vmul.f32 %v2693_v61, %v1725_v42  ;;  %v901_v57 = vmul.f32 %v2693_v61, %v1726_v43  ;;  %v1805_v44 = vld [vmem:[%s2368_s25 + $0x3f0] sm:$0xff] }
  0xcb   : > { %v1268_v58 = vmax.f32 %v1236_v50, 0.0  ;;  %v803_v3 = vadd.f32 %v2704_v10, %v767_v51  ;;  %v804_v59 = vadd.f32 %v2704_v10, %v768_v52  ;;  %v1061_v60 = vmul.f32 %v2693_v61, %v1757_v48 }
  0xcc   : > { %1870 = vmatprep.mubr.msk.bf16.mxu0 %vm1376_vm0, %v1342_v54  ;;  %v1269_v62 = vmax.f32 %v1237_v55, 0.0  ;;  %v932_v63 = vadd.f32 %v2704_v10, %v900_v56  ;;  %v933_v0 = vadd.f32 %v2704_v10, %v901_v57  ;;  %v1062_v1 = vmul.f32 %v2693_v61, %v1758_v53 }
  0xcd   : > { %v1300_v6 = vadd.f32 %v1268_v58, %v1139_v40  ;;  %v835_v4 = vmax.f32 %v803_v3, 0.0  ;;  %v836_v7 = vmax.f32 %v804_v59, 0.0  ;;  %v1093_v8 = vadd.f32 %v2704_v10, %v1061_v60 }
  0xce   : > { %v1301_v9 = vadd.f32 %v1269_v62, %v1140_v46  ;;  %v964_v11 = vmax.f32 %v932_v63, 0.0  ;;  %v965_v12 = vmax.f32 %v933_v0, 0.0  ;;  %v1094_v13 = vadd.f32 %v2704_v10, %v1062_v1 }
  0xcf   : > { %v1332_v16 = vadd.f32 %v1300_v6, %v1010_v45  ;;  %v1125_v17 = vmax.f32 %v1093_v8, 0.0  ;;  %v1190_v18 = vmul.f32 %v2693_v61, %v1789_v2  ;;  %v1191_v19 = vmul.f32 %v2693_v61, %v1790_v5  ;;  %v1806_v45 = vld [vmem:[%s2368_s25 + $0x3f8] sm:$0xff] }
  0xd0   : > { %v1333_v23 = vadd.f32 %v1301_v9, %v1011_v49  ;;  %v996_v24 = vadd.f32 %v964_v11, %v835_v4  ;;  %v997_v25 = vadd.f32 %v965_v12, %v836_v7  ;;  %v1126_v26 = vmax.f32 %v1094_v13, 0.0 }
  0xd1   : > { %v1222_v27 = vadd.f32 %v2704_v10, %v1190_v18  ;;  %v1223_v28 = vadd.f32 %v2704_v10, %v1191_v19  ;;  %v783_v29 = vmul.f32 %v2693_v61, %v747_v14  ;;  %v784_v30 = vmul.f32 %v2693_v61, %v748_v15 }
  0xd2   : > { %v1350_v32 = vpack.c.bf16 %v1333_v23, %v1332_v16  ;;  %v916_v33 = vmul.f32 %v2693_v61, %v1741_v20  ;;  %v917_v34 = vmul.f32 %v2693_v61, %v1742_v21  ;;  %v1077_v35 = vmul.f32 %v2693_v61, %v1773_v22 }
  0xd3   : > { %v1254_v36 = vmax.f32 %v1222_v27, 0.0  ;;  %v1255_v37 = vmax.f32 %v1223_v28, 0.0  ;;  %v819_v38 = vadd.f32 %v2704_v10, %v783_v29  ;;  %v820_v39 = vadd.f32 %v2704_v10, %v784_v30 }
  0xd4   : > { %1886 = vmatprep.mubr.msk.bf16.mxu1 %vm1376_vm0, %v1350_v32  ;;  %v948_v40 = vadd.f32 %v2704_v10, %v916_v33  ;;  %v949_v41 = vadd.f32 %v2704_v10, %v917_v34  ;;  %v1078_v42 = vmul.f32 %v2693_v61, %v1774_v31  ;;  %v1109_v43 = vadd.f32 %v2704_v10, %v1077_v35 }
  0xd5   : > { %v1286_v46 = vadd.f32 %v1254_v36, %v1125_v17  ;;  %v1287_v47 = vadd.f32 %v1255_v37, %v1126_v26  ;;  %v851_v48 = vmax.f32 %v819_v38, 0.0  ;;  %v852_v49 = vmax.f32 %v820_v39, 0.0 }
  0xd6   : > { %v980_v50 = vmax.f32 %v948_v40, 0.0  ;;  %v981_v51 = vmax.f32 %v949_v41, 0.0  ;;  %v1110_v52 = vadd.f32 %v2704_v10, %v1078_v42  ;;  %v1206_v55 = vmul.f32 %v2693_v61, %v1805_v44 }
  0xd7   : > { %v1318_v53 = vadd.f32 %v1286_v46, %v996_v24  ;;  %v1319_v54 = vadd.f32 %v1287_v47, %v997_v25  ;;  %v1207_v56 = vmul.f32 %v2693_v61, %v1806_v45  ;;  %v1141_v57 = vmax.f32 %v1109_v43, 0.0 }
  0xd8   : > { %v1142_v3 = vmax.f32 %v1110_v52, 0.0  ;;  %v1238_v59 = vadd.f32 %v2704_v10, %v1206_v55  ;;  %v1012_v62 = vadd.f32 %v980_v50, %v851_v48  ;;  %v1013_v63 = vadd.f32 %v981_v51, %v852_v49 }
  0xd9   : > { %v1343_v58 = vpack.c.bf16 %v1319_v54, %v1318_v53  ;;  %v1239_v60 = vadd.f32 %v2704_v10, %v1207_v56 }
  0xda   : > { %v1270_v0 = vmax.f32 %v1238_v59, 0.0 }
  0xdb   : > { %1871 = vmatmul.mubr.msk.bf16.gmra.mrb[12].mxu0 %vm1376_vm0, %v1343_v58  ;;  %v1271_v1 = vmax.f32 %v1239_v60, 0.0 }
  0xdc   : > { %v1302_v2 = vadd.f32 %v1270_v0, %v1141_v57 }
  0xdd   : > { %v1303_v5 = vadd.f32 %v1271_v1, %v1142_v3 }
  0xde   : > { %v1334_v6 = vadd.f32 %v1302_v2, %v1012_v62 }
  0xdf   : > { %v1335_v4 = vadd.f32 %v1303_v5, %v1013_v63 }
  0xe1   : > { %v1351_v7 = vpack.c.bf16 %v1335_v4, %v1334_v6 }
  0xe3   : > { %1887 = vmatmul.mubr.msk.bf16.gmra.mrb[12].mxu1 %vm1376_vm0, %v1351_v7 }
 0x152   : > { %v1860_v61 = vpop.f32.mrb[0].mxu0 }
 0x153   : > { %1588 = vst [vmem:[%s2781_s4 + $0x10] sm:$0xff] %v1860_v61  ;;  %v1459_v10 = vpop.f32.mrb[1].mxu0 }
 0x154   : > { %1586 = vst [vmem:[%s2781_s4] sm:$0xff] %v1459_v10  ;;  %v1861_v8 = vpop.f32.mrb[2].mxu0 }
 0x155   : > { %1589 = vst [vmem:[%s2781_s4 + $0x18] sm:$0xff] %v1861_v8  ;;  %v1462_v9 = vpop.f32.mrb[3].mxu0 }
 0x156   : > { %1587 = vst [vmem:[%s2781_s4 + $0x8] sm:$0xff] %v1462_v9 }
 0x159   : > { %v1876_v11 = vpop.f32.mrb[0].mxu1 }
 0x15a   : > { %1604 = vst [vmem:[%s2781_s4 + $0x90] sm:$0xff] %v1876_v11  ;;  %v1523_v12 = vpop.f32.mrb[1].mxu1 }
 0x15b   : > { %1602 = vst [vmem:[%s2781_s4 + $0x80] sm:$0xff] %v1523_v12  ;;  %v1877_v13 = vpop.f32.mrb[2].mxu1 }
 0x15c   : > { %1605 = vst [vmem:[%s2781_s4 + $0x98] sm:$0xff] %v1877_v13  ;;  %v1526_v14 = vpop.f32.mrb[3].mxu1 }
 0x15d   : > { %1603 = vst [vmem:[%s2781_s4 + $0x88] sm:$0xff] %v1526_v14 }
 0x170   : > { %v1864_v15 = vpop.f32.mrb[4].mxu0 }
 0x171   : > { %1592 = vst [vmem:[%s2781_s4 + $0x30] sm:$0xff] %v1864_v15  ;;  %v1475_v16 = vpop.f32.mrb[5].mxu0 }
 0x172   : > { %1590 = vst [vmem:[%s2781_s4 + $0x20] sm:$0xff] %v1475_v16  ;;  %v1865_v17 = vpop.f32.mrb[6].mxu0 }
 0x173   : > { %1593 = vst [vmem:[%s2781_s4 + $0x38] sm:$0xff] %v1865_v17  ;;  %v1478_v18 = vpop.f32.mrb[7].mxu0 }
 0x174   : > { %1591 = vst [vmem:[%s2781_s4 + $0x28] sm:$0xff] %v1478_v18 }
 0x178   : > { %v1880_v19 = vpop.f32.mrb[4].mxu1 }
 0x179   : > { %1608 = vst [vmem:[%s2781_s4 + $0xb0] sm:$0xff] %v1880_v19  ;;  %v1539_v20 = vpop.f32.mrb[5].mxu1 }
 0x17a   : > { %1606 = vst [vmem:[%s2781_s4 + $0xa0] sm:$0xff] %v1539_v20  ;;  %v1881_v21 = vpop.f32.mrb[6].mxu1 }
 0x17b   : > { %1609 = vst [vmem:[%s2781_s4 + $0xb8] sm:$0xff] %v1881_v21  ;;  %v1542_v22 = vpop.f32.mrb[7].mxu1 }
 0x17c   : > { %1607 = vst [vmem:[%s2781_s4 + $0xa8] sm:$0xff] %v1542_v22 }
 0x18f   : > { %v1868_v23 = vpop.f32.mrb[8].mxu0 }
 0x190   : > { %1596 = vst [vmem:[%s2781_s4 + $0x50] sm:$0xff] %v1868_v23  ;;  %v1491_v24 = vpop.f32.mrb[9].mxu0 }
 0x191   : > { %1594 = vst [vmem:[%s2781_s4 + $0x40] sm:$0xff] %v1491_v24  ;;  %v1869_v25 = vpop.f32.mrb[10].mxu0 }
 0x192   : > { %1597 = vst [vmem:[%s2781_s4 + $0x58] sm:$0xff] %v1869_v25  ;;  %v1494_v26 = vpop.f32.mrb[11].mxu0 }
 0x193   : > { %1595 = vst [vmem:[%s2781_s4 + $0x48] sm:$0xff] %v1494_v26 }
 0x197   : > { %v1884_v27 = vpop.f32.mrb[8].mxu1 }
 0x198   : > { %1612 = vst [vmem:[%s2781_s4 + $0xd0] sm:$0xff] %v1884_v27  ;;  %v1555_v28 = vpop.f32.mrb[9].mxu1 }
 0x199   : > { %1610 = vst [vmem:[%s2781_s4 + $0xc0] sm:$0xff] %v1555_v28  ;;  %v1885_v29 = vpop.f32.mrb[10].mxu1 }
 0x19a   : > { %1613 = vst [vmem:[%s2781_s4 + $0xd8] sm:$0xff] %v1885_v29  ;;  %v1558_v30 = vpop.f32.mrb[11].mxu1 }
 0x19b   : > { %1611 = vst [vmem:[%s2781_s4 + $0xc8] sm:$0xff] %v1558_v30 }
 0x1ae   : > { %v1872_v31 = vpop.f32.mrb[12].mxu0 }
 0x1af   : > { %1600 = vst [vmem:[%s2781_s4 + $0x70] sm:$0xff] %v1872_v31  ;;  %v1507_v32 = vpop.f32.mrb[13].mxu0 }
 0x1b0   : > { %1598 = vst [vmem:[%s2781_s4 + $0x60] sm:$0xff] %v1507_v32  ;;  %v1873_v33 = vpop.f32.mrb[14].mxu0 }
 0x1b1   : > { %1601 = vst [vmem:[%s2781_s4 + $0x78] sm:$0xff] %v1873_v33  ;;  %v1510_v34 = vpop.f32.mrb[15].mxu0 }
 0x1b2   : > { %1599 = vst [vmem:[%s2781_s4 + $0x68] sm:$0xff] %v1510_v34 }
 0x1b6   : > { %v1888_v35 = vpop.f32.mrb[12].mxu1 }
 0x1b7   : > { %1616 = vst [vmem:[%s2781_s4 + $0xf0] sm:$0xff] %v1888_v35  ;;  %v1571_v36 = vpop.f32.mrb[13].mxu1 }
 0x1b8   : > { %1614 = vst [vmem:[%s2781_s4 + $0xe0] sm:$0xff] %v1571_v36  ;;  %v1889_v37 = vpop.f32.mrb[14].mxu1 }
 0x1b9   : > { %1617 = vst [vmem:[%s2781_s4 + $0xf8] sm:$0xff] %v1889_v37  ;;  %v1574_v38 = vpop.f32.mrb[15].mxu1 }
 0x1ba   : > { %1615 = vst [vmem:[%s2781_s4 + $0xe8] sm:$0xff] %v1574_v38 }
 0x1bb   : > { %1955 = shalt.err (!%p1952_p5)
}
 0x1bc   : > { %s1956_s24 = scalar_lea.hbm %s2818_s10, 4096  ;;  %s1960_s27 = scalar_lea.hbm %s2870_s3, 8192 }
 0x1bd   : > { %p1957_p7 = scmp.ne.s32.totalorder %s2818_s10, %s1956_s24  ;;  %p1961_p12 = scmp.lt.u32.totalorder %s2818_s10, %s2870_s3 }
 0x1be   : > { %p1962_p13 = scmp.lt.u32.totalorder %s1960_s27, %s1956_s24  ;;  %p1964_p1 = scmp.lt.u32.totalorder %s1956_s24, %s2818_s10 }
 0x1bf   : > { %p1958_p10 = pnand %p1957_p7, %p2067_p6 }
 0x1c0   : > { %p1963_p0 = por %p1962_p13, %p1961_p12 }
 0x1c1   : > { %p1959_p11 = pneg %p1958_p10 }
 0x1c2   : > { %p1965_p2 = por %p1964_p1, %p1963_p0 }
 0x1c4   : > { %p1966_p3 = pnand %p1965_p2, %p1959_p11 }
 0x1c6   : > { %1969 = shalt.err (!%p1966_p3)
}
 0x1c7   : > { %s2007_s30 = smov 128   ;;  %s2008_s4 = smov 8  }
 0x1c8   : > { %1896 = dma.vmem_to_hbm [thread:$0]  (%p2067_p6), %s2820_s7, 4096, %s2818_s10, %s1619_s16, %s2007_s30, %s2007_s30, %s2008_s4  }
 0x1c9 PF: > { %s1647_s5 = sand.u32 1, %s1992_s12   ;;  %p1899_p4 = pnand %p1702_p9, %p2071_p8 }
 0x1ca   : > { %s1648_s8 = scalar_lea.sflag [#allocation4], %s1647_s5 }
 0x1cb   : > { %1987 = dma.done.wait (!%p1899_p4), %s1648_s8, 4096  }
 0x1cc   : > { %1989 = vsyncadd (!%p1899_p4), %s1648_s8, 4294963200  ;;  %p13_p5 = scmp.ge.s32.totalorder %s2052_s18, 4   ;;  %s2873_s12 = smov %s1996_s13 }
 0x1cd   : > { %s2874_s13 = smov %s2000_s14  ;;  %s2875_s14 = smov %s2065_s21 }
 0x1ce   : > { %s2876_s15 = smov %s2052_s18  ;;  %15 = sbr.rel (!%p13_p5) target bundleno = 3 (0x3), region = 113 }
 0x1d5   :  { %1653 = vsyncpa [#allocation4], 1 }
 0x1d6   :  { %1655 = vsyncpa [#allocation4 + $0x1], 1 }

</bundles_post_ra>
